<compile_context>
chip_gen: v7x
topology: tpu7x:2x2x1
jax: 0.10.0
libtpu: 0.0.40
codegen_flags: <defaults>
</compile_context>

<pallas_src>
import functools

import jax
import jax.numpy as jnp
from jax.experimental import pallas as pl
from jax.experimental.pallas import tpu as pltpu


def _round_up(x, m):
    return ((x + m - 1) // m) * m


# ---------------------------------------------------------------------------
# Stage 1 (layer 0 only): feature transform  H = X @ W   (bf16 in / bf16 out)
# ---------------------------------------------------------------------------
def _xw_kernel(x_ref, w_ref, h_ref):
    h_ref[...] = jnp.dot(
        x_ref[...], w_ref[...], preferred_element_type=jnp.float32
    ).astype(h_ref.dtype)


def feature_transform(x_pad, w_pad, tm):
    n_pad, f_in_pad = x_pad.shape
    f_out_pad = w_pad.shape[1]
    return pl.pallas_call(
        _xw_kernel,
        out_shape=jax.ShapeDtypeStruct((n_pad, f_out_pad), jnp.bfloat16),
        grid=(n_pad // tm,),
        in_specs=[
            pl.BlockSpec((tm, f_in_pad), lambda i: (i, 0)),
            pl.BlockSpec((f_in_pad, f_out_pad), lambda i: (0, 0)),
        ],
        out_specs=pl.BlockSpec((tm, f_out_pad), lambda i: (i, 0)),
        compiler_params=pltpu.CompilerParams(dimension_semantics=("parallel",)),
    )(x_pad, w_pad)


# ---------------------------------------------------------------------------
# Shared epilogue math: z -> relu(LayerNorm(z)) with real-feature-count stats.
# Padded feature columns of z are exactly zero, and gamma/beta are zero there,
# so the result keeps padded columns at exactly zero.
# ---------------------------------------------------------------------------
def _ln_relu(z, g, be, n_feat):
    inv_n = jnp.float32(1.0 / n_feat)
    s = jnp.sum(z, axis=-1, keepdims=True)
    ss = jnp.sum(z * z, axis=-1, keepdims=True)
    mean = s * inv_n
    var = jnp.maximum(ss * inv_n - mean * mean, 0.0)
    ln = (z - mean) * jax.lax.rsqrt(var + 1e-5) * g + be
    return jnp.maximum(ln, 0.0)


# ---------------------------------------------------------------------------
# Stage 2a: tiled aggregation + LN + ReLU   O = relu(LN(A @ H + b))
# ---------------------------------------------------------------------------
def _agg_ln_relu_kernel(a_ref, h_ref, b_ref, g_ref, be_ref, o_ref, acc_ref, *,
                        n_feat):
    k = pl.program_id(1)

    @pl.when(k == 0)
    def _():
        acc_ref[...] = jnp.zeros_like(acc_ref)

    acc_ref[...] += jnp.dot(
        a_ref[...], h_ref[...], preferred_element_type=jnp.float32
    )

    @pl.when(k == pl.num_programs(1) - 1)
    def _():
        z = acc_ref[...] + b_ref[...]
        o_ref[...] = _ln_relu(z, g_ref[...], be_ref[...], n_feat).astype(o_ref.dtype)


# ---------------------------------------------------------------------------
# Stage 2b: same, but the epilogue also applies the NEXT layer's weight:
#   O = relu(LN(A @ H + b)) @ W_next
# (saves one standalone X@W kernel + one activation HBM round trip per layer)
# ---------------------------------------------------------------------------
def _agg_ln_relu_nextw_kernel(a_ref, h_ref, b_ref, g_ref, be_ref, wn_ref,
                              o_ref, acc_ref, *, n_feat):
    k = pl.program_id(1)

    @pl.when(k == 0)
    def _():
        acc_ref[...] = jnp.zeros_like(acc_ref)

    acc_ref[...] += jnp.dot(
        a_ref[...], h_ref[...], preferred_element_type=jnp.float32
    )

    @pl.when(k == pl.num_programs(1) - 1)
    def _():
        z = acc_ref[...] + b_ref[...]
        act = _ln_relu(z, g_ref[...], be_ref[...], n_feat).astype(jnp.bfloat16)
        o_ref[...] = jnp.dot(
            act, wn_ref[...], preferred_element_type=jnp.float32
        ).astype(o_ref.dtype)


def aggregate_ln_relu(a_pad, h_pad, b_pad, g_pad, be_pad, *, n_feat, tm, tk,
                      w_next_pad=None):
    n_pad = a_pad.shape[0]
    f_out_pad = h_pad.shape[1]

    base_specs = [
        pl.BlockSpec((tm, tk), lambda i, k: (i, k)),            # A tile
        pl.BlockSpec((tk, f_out_pad), lambda i, k: (k, 0)),     # H tile
        pl.BlockSpec((1, f_out_pad), lambda i, k: (0, 0)),      # bias
        pl.BlockSpec((1, f_out_pad), lambda i, k: (0, 0)),      # gamma
        pl.BlockSpec((1, f_out_pad), lambda i, k: (0, 0)),      # beta
    ]
    if w_next_pad is None:
        kernel = functools.partial(_agg_ln_relu_kernel, n_feat=n_feat)
        out_cols = f_out_pad
        extra_in, extra_specs = (), []
    else:
        kernel = functools.partial(_agg_ln_relu_nextw_kernel, n_feat=n_feat)
        out_cols = w_next_pad.shape[1]
        extra_in = (w_next_pad,)
        extra_specs = [pl.BlockSpec((f_out_pad, out_cols), lambda i, k: (0, 0))]

    return pl.pallas_call(
        kernel,
        out_shape=jax.ShapeDtypeStruct((n_pad, out_cols), jnp.bfloat16),
        grid=(n_pad // tm, n_pad // tk),
        in_specs=base_specs + extra_specs,
        out_specs=pl.BlockSpec((tm, out_cols), lambda i, k: (i, 0)),
        scratch_shapes=[pltpu.VMEM((tm, f_out_pad), jnp.float32)],
        compiler_params=pltpu.CompilerParams(
            dimension_semantics=("parallel", "arbitrary")),
    )(a_pad, h_pad, b_pad, g_pad, be_pad, *extra_in)


# ---------------------------------------------------------------------------
# Glue: dense symmetric-normalized adjacency (GCN style, self loops)
# ---------------------------------------------------------------------------
def build_norm_adj(edge_index, num_nodes):
    src, dst = edge_index[0], edge_index[1]
    a = jnp.zeros((num_nodes, num_nodes), jnp.float32)
    # message flows src -> dst: row = dst (receiver), col = src (sender)
    a = a.at[dst, src].set(1.0)
    idx = jnp.arange(num_nodes)
    a = a.at[idx, idx].set(1.0)   # exactly one self loop per node
    deg = jnp.sum(a, axis=1)
    d_inv_sqrt = jnp.where(deg > 0, jax.lax.rsqrt(deg), 0.0)
    return a * d_inv_sqrt[:, None] * d_inv_sqrt[None, :]


# ---------------------------------------------------------------------------
# GNN module: n_layers of (conv -> dropout(eval) -> LayerNorm -> ReLU)
# ---------------------------------------------------------------------------
def init_gnn_params(key, n_in, n_hid, n_layers):
    params = []
    for i in range(n_layers):
        f_in = n_in if i == 0 else n_hid
        key, kw = jax.random.split(key)
        scale = jnp.sqrt(2.0 / (f_in + n_hid)).astype(jnp.float32)
        w = jax.random.normal(kw, (f_in, n_hid), jnp.float32) * scale
        b = jnp.zeros((1, n_hid), jnp.float32)
        gamma = jnp.ones((1, n_hid), jnp.float32)   # LayerNorm weight
        beta = jnp.zeros((1, n_hid), jnp.float32)   # LayerNorm bias
        params.append((w, b, gamma, beta))
    return params


def _gnn_forward_impl(x, edge_index, params):
    # mirrors GNN.forward: a single edge_index is reused for every layer
    n, f_in = x.shape
    n_hid = params[0][0].shape[1]

    # padded sizes / tile sizes (tiles are guaranteed divisors of n_pad)
    n_pad = _round_up(n, 128)
    tm = 256 if n_pad % 256 == 0 else 128
    tk = 512 if n_pad % 512 == 0 else (256 if n_pad % 256 == 0 else 128)
    f_in_pad = _round_up(f_in, 128)

    # A built once, cast to bf16 once, reused (bf16 MXU stream) every layer.
    a = build_norm_adj(edge_index, n)
    a_pad = jnp.zeros((n_pad, n_pad), jnp.bfloat16).at[:n, :n].set(
        a.astype(jnp.bfloat16))

    x_pad = jnp.zeros((n_pad, f_in_pad), jnp.bfloat16).at[:n, :f_in].set(
        x.astype(jnp.bfloat16))

    # pad all layer params once
    padded = []
    for (w, b, gamma, beta) in params:
        fi, fo = w.shape
        fi_pad = _round_up(fi, 128)
        fo_pad = _round_up(fo, 128)
        w_pad = jnp.zeros((fi_pad, fo_pad), jnp.bfloat16).at[:fi, :fo].set(
            w.astype(jnp.bfloat16))
        b_pad = jnp.zeros((1, fo_pad), jnp.float32).at[:, :fo].set(
            b.reshape(1, -1))
        g_pad = jnp.zeros((1, fo_pad), jnp.float32).at[:, :fo].set(
            gamma.reshape(1, -1))
        be_pad = jnp.zeros((1, fo_pad), jnp.float32).at[:, :fo].set(
            beta.reshape(1, -1))
        padded.append((w_pad, b_pad, g_pad, be_pad, fo))

    # Layer 0 feature transform H0 = X @ W0 (only standalone X@W kernel).
    h = feature_transform(x_pad, padded[0][0], tm)

    n_layers = len(padded)
    for li in range(n_layers):
        _, b_pad, g_pad, be_pad, fo = padded[li]
        w_next = padded[li + 1][0] if li + 1 < n_layers else None
        # relu(LN(A @ H + b))  [ @ W_next fused for all but the last layer ]
        h = aggregate_ln_relu(a_pad, h, b_pad, g_pad, be_pad,
                              n_feat=fo, tm=tm, tk=tk, w_next_pad=w_next)
        # TODO(synk): nn.Dropout is identity in eval mode; training-mode
        # stochastic dropout (pltpu.prng_*) intentionally not applied here.

    # TODO(synk): for realistically sparse graphs, replace the dense A@H with a
    # scalar-prefetched CSR gather-aggregate (PrefetchScalarGridSpec) instead
    # of an N x N dense matmul.
    return h[:n, :n_hid].astype(jnp.float32)


# single compiled graph: adjacency build + padding + all layers
gnn_forward = jax.jit(_gnn_forward_impl)


if __name__ == "__main__":
    key = jax.random.PRNGKey(0)

    # small shapes consistent with the module
    num_nodes = 16
    n_in = 16
    n_hid = 32
    n_layers = 2
    num_edges = 40

    k_x, k_e, k_p = jax.random.split(key, 3)
    x = jax.random.normal(k_x, (num_nodes, n_in), jnp.float32)
    edge_index = jax.random.randint(k_e, (2, num_edges), 0, num_nodes, jnp.int32)

    params = init_gnn_params(k_p, n_in, n_hid, n_layers)

    out = gnn_forward(x, edge_index, params)
    out = jax.block_until_ready(out)

    assert out.shape == (num_nodes, n_hid)
    assert bool(jnp.all(jnp.isfinite(out)))
    assert bool(jnp.all(out >= 0.0))   # ReLU output
    print("KERNEL_OK")
</pallas_src>

<mosaic_0001>
module attributes {stable_mosaic.version = 11 : i64} {
  func.func @_xw_kernel(%arg0: i32, %arg1: memref<128x128xbf16, #tpu.memory_space<vmem>>, %arg2: memref<128x128xbf16, #tpu.memory_space<vmem>>, %arg3: memref<128x128xbf16, #tpu.memory_space<vmem>>) attributes {dimension_semantics = [#tpu.dimension_semantics<parallel>], iteration_bounds = array<i64: 1>, scalar_prefetch = 0 : i64, scratch_operands = 0 : i64, tpu.core_type = #tpu.core_type<tc>, window_params = [{transform_indices = @transform_0, window_bounds = array<i64: 128, 128>}, {pipeline_mode = #tpu.pipeline_mode<synchronous>, transform_indices = @transform_1, window_bounds = array<i64: 128, 128>}, {transform_indices = @transform_2, window_bounds = array<i64: 128, 128>}]} {
    %c0 = arith.constant 0 : index
    %c0_0 = arith.constant 0 : index
    %0 = vector.load %arg1[%c0, %c0_0] : memref<128x128xbf16, #tpu.memory_space<vmem>>, vector<128x128xbf16>
    %c0_1 = arith.constant 0 : index
    %c0_2 = arith.constant 0 : index
    %1 = vector.load %arg2[%c0_1, %c0_2] : memref<128x128xbf16, #tpu.memory_space<vmem>>, vector<128x128xbf16>
    %cst = arith.constant dense<0.000000e+00> : vector<128x128xf32>
    %2 = tpu.matmul %0, %1, %cst {dimension_numbers = #tpu.dot_dimension_numbers<[1], [0], [0], [1], [0, 0, 1, 1], [], []>} : vector<128x128xbf16>, vector<128x128xbf16>, vector<128x128xf32> -> vector<128x128xf32>
    %3 = arith.truncf %2 : vector<128x128xf32> to vector<128x128xbf16>
    %c0_3 = arith.constant 0 : index
    %c0_4 = arith.constant 0 : index
    %4 = vector.load %arg3[%c0_3, %c0_4] : memref<128x128xbf16, #tpu.memory_space<vmem>>, vector<128x128xbf16>
    tpu.vector_store %arg3[%c0_3, %c0_4], %3 {strides = array<i32>} : memref<128x128xbf16, #tpu.memory_space<vmem>>, vector<128x128xbf16>,
    return
  }
  func.func @transform_0(%arg0: i32) -> (i32, i32) {
    %c0_i32 = arith.constant 0 : i32
    %c0_i32_0 = arith.constant 0 : i32
    return %arg0, %c0_i32 : i32, i32
  }
  func.func @transform_1(%arg0: i32) -> (i32, i32) {
    %c0_i32 = arith.constant 0 : i32
    %c0_i32_0 = arith.constant 0 : i32
    %c0_i32_1 = arith.constant 0 : i32
    return %c0_i32, %c0_i32_0 : i32, i32
  }
  func.func @transform_2(%arg0: i32) -> (i32, i32) {
    %c0_i32 = arith.constant 0 : i32
    %c0_i32_0 = arith.constant 0 : i32
    return %arg0, %c0_i32 : i32, i32
  }
}

module attributes {stable_mosaic.version = 11 : i64} {
  func.func @_agg_ln_relu_nextw_kernel(%arg0: i32, %arg1: i32, %arg2: memref<128x128xbf16, #tpu.memory_space<vmem>>, %arg3: memref<128x128xbf16, #tpu.memory_space<vmem>>, %arg4: memref<1x128xf32, #tpu.memory_space<vmem>>, %arg5: memref<1x128xf32, #tpu.memory_space<vmem>>, %arg6: memref<1x128xf32, #tpu.memory_space<vmem>>, %arg7: memref<128x128xbf16, #tpu.memory_space<vmem>>, %arg8: memref<128x128xbf16, #tpu.memory_space<vmem>>, %arg9: memref<128x128xf32, #tpu.memory_space<vmem>>) attributes {dimension_semantics = [#tpu.dimension_semantics<parallel>, #tpu.dimension_semantics<arbitrary>], iteration_bounds = array<i64: 1, 1>, scalar_prefetch = 0 : i64, scratch_operands = 1 : i64, tpu.core_type = #tpu.core_type<tc>, window_params = [{transform_indices = @transform_0, window_bounds = array<i64: 128, 128>}, {transform_indices = @transform_1, window_bounds = array<i64: 128, 128>}, {pipeline_mode = #tpu.pipeline_mode<synchronous>, transform_indices = @transform_2, window_bounds = array<i64: 1, 128>}, {pipeline_mode = #tpu.pipeline_mode<synchronous>, transform_indices = @transform_3, window_bounds = array<i64: 1, 128>}, {pipeline_mode = #tpu.pipeline_mode<synchronous>, transform_indices = @transform_4, window_bounds = array<i64: 1, 128>}, {pipeline_mode = #tpu.pipeline_mode<synchronous>, transform_indices = @transform_5, window_bounds = array<i64: 128, 128>}, {transform_indices = @transform_6, window_bounds = array<i64: 128, 128>}]} {
    %c0_i32 = arith.constant 0 : i32
    %0 = arith.cmpi eq, %arg1, %c0_i32 : i32
    %1 = arith.extui %0 : i1 to i32
    %c0_i32_0 = arith.constant 0 : i32
    %2 = arith.cmpi ne, %1, %c0_i32_0 : i32
    scf.if %2 {
      %cst_10 = arith.constant 0.000000e+00 : f32
      %12 = vector.broadcast %cst_10 : f32 to vector<128x128xf32>
      %c0_11 = arith.constant 0 : index
      %c0_12 = arith.constant 0 : index
      %13 = vector.load %arg9[%c0_11, %c0_12] : memref<128x128xf32, #tpu.memory_space<vmem>>, vector<128x128xf32>
      tpu.vector_store %arg9[%c0_11, %c0_12], %12 {strides = array<i32>} : memref<128x128xf32, #tpu.memory_space<vmem>>, vector<128x128xf32>,
    } else {
    }
    %c0 = arith.constant 0 : index
    %c0_1 = arith.constant 0 : index
    %3 = vector.load %arg9[%c0, %c0_1] : memref<128x128xf32, #tpu.memory_space<vmem>>, vector<128x128xf32>
    %c0_2 = arith.constant 0 : index
    %c0_3 = arith.constant 0 : index
    %4 = vector.load %arg2[%c0_2, %c0_3] : memref<128x128xbf16, #tpu.memory_space<vmem>>, vector<128x128xbf16>
    %c0_4 = arith.constant 0 : index
    %c0_5 = arith.constant 0 : index
    %5 = vector.load %arg3[%c0_4, %c0_5] : memref<128x128xbf16, #tpu.memory_space<vmem>>, vector<128x128xbf16>
    %cst = arith.constant dense<0.000000e+00> : vector<128x128xf32>
    %6 = tpu.matmul %4, %5, %cst {dimension_numbers = #tpu.dot_dimension_numbers<[1], [0], [0], [1], [0, 0, 1, 1], [], []>} : vector<128x128xbf16>, vector<128x128xbf16>, vector<128x128xf32> -> vector<128x128xf32>
    %7 = arith.addf %3, %6 : vector<128x128xf32>
    %c0_6 = arith.constant 0 : index
    %c0_7 = arith.constant 0 : index
    %8 = vector.load %arg9[%c0_6, %c0_7] : memref<128x128xf32, #tpu.memory_space<vmem>>, vector<128x128xf32>
    tpu.vector_store %arg9[%c0_6, %c0_7], %7 {strides = array<i32>} : memref<128x128xf32, #tpu.memory_space<vmem>>, vector<128x128xf32>,
    %c0_i32_8 = arith.constant 0 : i32
    %9 = arith.cmpi eq, %arg1, %c0_i32_8 : i32
    %10 = arith.extui %9 : i1 to i32
    %c0_i32_9 = arith.constant 0 : i32
    %11 = arith.cmpi ne, %10, %c0_i32_9 : i32
    scf.if %11 {
      %c0_10 = arith.constant 0 : index
      %c0_11 = arith.constant 0 : index
      %12 = vector.load %arg9[%c0_10, %c0_11] : memref<128x128xf32, #tpu.memory_space<vmem>>, vector<128x128xf32>
      %c0_12 = arith.constant 0 : index
      %c0_13 = arith.constant 0 : index
      %13 = vector.load %arg4[%c0_12, %c0_13] : memref<1x128xf32, #tpu.memory_space<vmem>>, vector<1x128xf32>
      %14 = vector.broadcast %13 : vector<1x128xf32> to vector<128x128xf32>
      %15 = arith.addf %12, %14 : vector<128x128xf32>
      %c0_14 = arith.constant 0 : index
      %c0_15 = arith.constant 0 : index
      %16 = vector.load %arg5[%c0_14, %c0_15] : memref<1x128xf32, #tpu.memory_space<vmem>>, vector<1x128xf32>
      %c0_16 = arith.constant 0 : index
      %c0_17 = arith.constant 0 : index
      %17 = vector.load %arg6[%c0_16, %c0_17] : memref<1x128xf32, #tpu.memory_space<vmem>>, vector<1x128xf32>
      %cst_18 = arith.constant dense<0.000000e+00> : vector<128xf32>
      %18 = vector.multi_reduction <add>, %15, %cst_18 [1] : vector<128x128xf32> to vector<128xf32>
      %19 = vector.shape_cast %18 : vector<128xf32> to vector<128x1xf32>
      %20 = arith.mulf %15, %15 : vector<128x128xf32>
      %cst_19 = arith.constant dense<0.000000e+00> : vector<128xf32>
      %21 = vector.multi_reduction <add>, %20, %cst_19 [1] : vector<128x128xf32> to vector<128xf32>
      %22 = vector.shape_cast %21 : vector<128xf32> to vector<128x1xf32>
      %cst_20 = arith.constant 3.125000e-02 : f32
      %23 = vector.broadcast %cst_20 : f32 to vector<128x1xf32>
      %24 = arith.mulf %19, %23 : vector<128x1xf32>
      %cst_21 = arith.constant 3.125000e-02 : f32
      %25 = vector.broadcast %cst_21 : f32 to vector<128x1xf32>
      %26 = arith.mulf %22, %25 : vector<128x1xf32>
      %27 = arith.mulf %24, %24 : vector<128x1xf32>
      %28 = arith.subf %26, %27 : vector<128x1xf32>
      %cst_22 = arith.constant 0.000000e+00 : f32
      %29 = vector.broadcast %cst_22 : f32 to vector<128x1xf32>
      %30 = arith.maximumf %28, %29 : vector<128x1xf32>
      %31 = vector.broadcast %24 : vector<128x1xf32> to vector<128x128xf32>
      %32 = arith.subf %15, %31 : vector<128x128xf32>
      %cst_23 = arith.constant 9.99999974E-6 : f32
      %33 = vector.broadcast %cst_23 : f32 to vector<128x1xf32>
      %34 = arith.addf %30, %33 : vector<128x1xf32>
      %35 = math.rsqrt %34 : vector<128x1xf32>
      %36 = vector.broadcast %35 : vector<128x1xf32> to vector<128x128xf32>
      %37 = arith.mulf %32, %36 : vector<128x128xf32>
      %38 = vector.broadcast %16 : vector<1x128xf32> to vector<128x128xf32>
      %39 = arith.mulf %37, %38 : vector<128x128xf32>
      %40 = vector.broadcast %17 : vector<1x128xf32> to vector<128x128xf32>
      %41 = arith.addf %39, %40 : vector<128x128xf32>
      %cst_24 = arith.constant 0.000000e+00 : f32
      %42 = vector.broadcast %cst_24 : f32 to vector<128x128xf32>
      %43 = arith.maximumf %41, %42 : vector<128x128xf32>
      %44 = arith.truncf %43 : vector<128x128xf32> to vector<128x128xbf16>
      %c0_25 = arith.constant 0 : index
      %c0_26 = arith.constant 0 : index
      %45 = vector.load %arg7[%c0_25, %c0_26] : memref<128x128xbf16, #tpu.memory_space<vmem>>, vector<128x128xbf16>
      %cst_27 = arith.constant dense<0.000000e+00> : vector<128x128xf32>
      %46 = tpu.matmul %44, %45, %cst_27 {dimension_numbers = #tpu.dot_dimension_numbers<[1], [0], [0], [1], [0, 0, 1, 1], [], []>} : vector<128x128xbf16>, vector<128x128xbf16>, vector<128x128xf32> -> vector<128x128xf32>
      %47 = arith.truncf %46 : vector<128x128xf32> to vector<128x128xbf16>
      %c0_28 = arith.constant 0 : index
      %c0_29 = arith.constant 0 : index
      %48 = vector.load %arg8[%c0_28, %c0_29] : memref<128x128xbf16, #tpu.memory_space<vmem>>, vector<128x128xbf16>
      tpu.vector_store %arg8[%c0_28, %c0_29], %47 {strides = array<i32>} : memref<128x128xbf16, #tpu.memory_space<vmem>>, vector<128x128xbf16>,
    } else {
    }
    return
  }
  func.func @transform_0(%arg0: i32, %arg1: i32) -> (i32, i32) {
    %c0_i32 = arith.constant 0 : i32
    return %arg0, %arg1 : i32, i32
  }
  func.func @transform_1(%arg0: i32, %arg1: i32) -> (i32, i32) {
    %c0_i32 = arith.constant 0 : i32
    %c0_i32_0 = arith.constant 0 : i32
    return %arg1, %c0_i32 : i32, i32
  }
  func.func @transform_2(%arg0: i32, %arg1: i32) -> (i32, i32) {
    %c0_i32 = arith.constant 0 : i32
    %c0_i32_0 = arith.constant 0 : i32
    %c0_i32_1 = arith.constant 0 : i32
    return %c0_i32, %c0_i32_0 : i32, i32
  }
  func.func @transform_3(%arg0: i32, %arg1: i32) -> (i32, i32) {
    %c0_i32 = arith.constant 0 : i32
    %c0_i32_0 = arith.constant 0 : i32
    %c0_i32_1 = arith.constant 0 : i32
    return %c0_i32, %c0_i32_0 : i32, i32
  }
  func.func @transform_4(%arg0: i32, %arg1: i32) -> (i32, i32) {
    %c0_i32 = arith.constant 0 : i32
    %c0_i32_0 = arith.constant 0 : i32
    %c0_i32_1 = arith.constant 0 : i32
    return %c0_i32, %c0_i32_0 : i32, i32
  }
  func.func @transform_5(%arg0: i32, %arg1: i32) -> (i32, i32) {
    %c0_i32 = arith.constant 0 : i32
    %c0_i32_0 = arith.constant 0 : i32
    %c0_i32_1 = arith.constant 0 : i32
    return %c0_i32, %c0_i32_0 : i32, i32
  }
  func.func @transform_6(%arg0: i32, %arg1: i32) -> (i32, i32) {
    %c0_i32 = arith.constant 0 : i32
    %c0_i32_0 = arith.constant 0 : i32
    return %arg0, %c0_i32 : i32, i32
  }
}

module attributes {stable_mosaic.version = 11 : i64} {
  func.func @_agg_ln_relu_kernel(%arg0: i32, %arg1: i32, %arg2: memref<128x128xbf16, #tpu.memory_space<vmem>>, %arg3: memref<128x128xbf16, #tpu.memory_space<vmem>>, %arg4: memref<1x128xf32, #tpu.memory_space<vmem>>, %arg5: memref<1x128xf32, #tpu.memory_space<vmem>>, %arg6: memref<1x128xf32, #tpu.memory_space<vmem>>, %arg7: memref<128x128xbf16, #tpu.memory_space<vmem>>, %arg8: memref<128x128xf32, #tpu.memory_space<vmem>>) attributes {dimension_semantics = [#tpu.dimension_semantics<parallel>, #tpu.dimension_semantics<arbitrary>], iteration_bounds = array<i64: 1, 1>, scalar_prefetch = 0 : i64, scratch_operands = 1 : i64, tpu.core_type = #tpu.core_type<tc>, window_params = [{transform_indices = @transform_0, window_bounds = array<i64: 128, 128>}, {transform_indices = @transform_1, window_bounds = array<i64: 128, 128>}, {pipeline_mode = #tpu.pipeline_mode<synchronous>, transform_indices = @transform_2, window_bounds = array<i64: 1, 128>}, {pipeline_mode = #tpu.pipeline_mode<synchronous>, transform_indices = @transform_3, window_bounds = array<i64: 1, 128>}, {pipeline_mode = #tpu.pipeline_mode<synchronous>, transform_indices = @transform_4, window_bounds = array<i64: 1, 128>}, {transform_indices = @transform_5, window_bounds = array<i64: 128, 128>}]} {
    %c0_i32 = arith.constant 0 : i32
    %0 = arith.cmpi eq, %arg1, %c0_i32 : i32
    %1 = arith.extui %0 : i1 to i32
    %c0_i32_0 = arith.constant 0 : i32
    %2 = arith.cmpi ne, %1, %c0_i32_0 : i32
    scf.if %2 {
      %cst_10 = arith.constant 0.000000e+00 : f32
      %12 = vector.broadcast %cst_10 : f32 to vector<128x128xf32>
      %c0_11 = arith.constant 0 : index
      %c0_12 = arith.constant 0 : index
      %13 = vector.load %arg8[%c0_11, %c0_12] : memref<128x128xf32, #tpu.memory_space<vmem>>, vector<128x128xf32>
      tpu.vector_store %arg8[%c0_11, %c0_12], %12 {strides = array<i32>} : memref<128x128xf32, #tpu.memory_space<vmem>>, vector<128x128xf32>,
    } else {
    }
    %c0 = arith.constant 0 : index
    %c0_1 = arith.constant 0 : index
    %3 = vector.load %arg8[%c0, %c0_1] : memref<128x128xf32, #tpu.memory_space<vmem>>, vector<128x128xf32>
    %c0_2 = arith.constant 0 : index
    %c0_3 = arith.constant 0 : index
    %4 = vector.load %arg2[%c0_2, %c0_3] : memref<128x128xbf16, #tpu.memory_space<vmem>>, vector<128x128xbf16>
    %c0_4 = arith.constant 0 : index
    %c0_5 = arith.constant 0 : index
    %5 = vector.load %arg3[%c0_4, %c0_5] : memref<128x128xbf16, #tpu.memory_space<vmem>>, vector<128x128xbf16>
    %cst = arith.constant dense<0.000000e+00> : vector<128x128xf32>
    %6 = tpu.matmul %4, %5, %cst {dimension_numbers = #tpu.dot_dimension_numbers<[1], [0], [0], [1], [0, 0, 1, 1], [], []>} : vector<128x128xbf16>, vector<128x128xbf16>, vector<128x128xf32> -> vector<128x128xf32>
    %7 = arith.addf %3, %6 : vector<128x128xf32>
    %c0_6 = arith.constant 0 : index
    %c0_7 = arith.constant 0 : index
    %8 = vector.load %arg8[%c0_6, %c0_7] : memref<128x128xf32, #tpu.memory_space<vmem>>, vector<128x128xf32>
    tpu.vector_store %arg8[%c0_6, %c0_7], %7 {strides = array<i32>} : memref<128x128xf32, #tpu.memory_space<vmem>>, vector<128x128xf32>,
    %c0_i32_8 = arith.constant 0 : i32
    %9 = arith.cmpi eq, %arg1, %c0_i32_8 : i32
    %10 = arith.extui %9 : i1 to i32
    %c0_i32_9 = arith.constant 0 : i32
    %11 = arith.cmpi ne, %10, %c0_i32_9 : i32
    scf.if %11 {
      %c0_10 = arith.constant 0 : index
      %c0_11 = arith.constant 0 : index
      %12 = vector.load %arg8[%c0_10, %c0_11] : memref<128x128xf32, #tpu.memory_space<vmem>>, vector<128x128xf32>
      %c0_12 = arith.constant 0 : index
      %c0_13 = arith.constant 0 : index
      %13 = vector.load %arg4[%c0_12, %c0_13] : memref<1x128xf32, #tpu.memory_space<vmem>>, vector<1x128xf32>
      %14 = vector.broadcast %13 : vector<1x128xf32> to vector<128x128xf32>
      %15 = arith.addf %12, %14 : vector<128x128xf32>
      %c0_14 = arith.constant 0 : index
      %c0_15 = arith.constant 0 : index
      %16 = vector.load %arg5[%c0_14, %c0_15] : memref<1x128xf32, #tpu.memory_space<vmem>>, vector<1x128xf32>
      %c0_16 = arith.constant 0 : index
      %c0_17 = arith.constant 0 : index
      %17 = vector.load %arg6[%c0_16, %c0_17] : memref<1x128xf32, #tpu.memory_space<vmem>>, vector<1x128xf32>
      %cst_18 = arith.constant dense<0.000000e+00> : vector<128xf32>
      %18 = vector.multi_reduction <add>, %15, %cst_18 [1] : vector<128x128xf32> to vector<128xf32>
      %19 = vector.shape_cast %18 : vector<128xf32> to vector<128x1xf32>
      %20 = arith.mulf %15, %15 : vector<128x128xf32>
      %cst_19 = arith.constant dense<0.000000e+00> : vector<128xf32>
      %21 = vector.multi_reduction <add>, %20, %cst_19 [1] : vector<128x128xf32> to vector<128xf32>
      %22 = vector.shape_cast %21 : vector<128xf32> to vector<128x1xf32>
      %cst_20 = arith.constant 3.125000e-02 : f32
      %23 = vector.broadcast %cst_20 : f32 to vector<128x1xf32>
      %24 = arith.mulf %19, %23 : vector<128x1xf32>
      %cst_21 = arith.constant 3.125000e-02 : f32
      %25 = vector.broadcast %cst_21 : f32 to vector<128x1xf32>
      %26 = arith.mulf %22, %25 : vector<128x1xf32>
      %27 = arith.mulf %24, %24 : vector<128x1xf32>
      %28 = arith.subf %26, %27 : vector<128x1xf32>
      %cst_22 = arith.constant 0.000000e+00 : f32
      %29 = vector.broadcast %cst_22 : f32 to vector<128x1xf32>
      %30 = arith.maximumf %28, %29 : vector<128x1xf32>
      %31 = vector.broadcast %24 : vector<128x1xf32> to vector<128x128xf32>
      %32 = arith.subf %15, %31 : vector<128x128xf32>
      %cst_23 = arith.constant 9.99999974E-6 : f32
      %33 = vector.broadcast %cst_23 : f32 to vector<128x1xf32>
      %34 = arith.addf %30, %33 : vector<128x1xf32>
      %35 = math.rsqrt %34 : vector<128x1xf32>
      %36 = vector.broadcast %35 : vector<128x1xf32> to vector<128x128xf32>
      %37 = arith.mulf %32, %36 : vector<128x128xf32>
      %38 = vector.broadcast %16 : vector<1x128xf32> to vector<128x128xf32>
      %39 = arith.mulf %37, %38 : vector<128x128xf32>
      %40 = vector.broadcast %17 : vector<1x128xf32> to vector<128x128xf32>
      %41 = arith.addf %39, %40 : vector<128x128xf32>
      %cst_24 = arith.constant 0.000000e+00 : f32
      %42 = vector.broadcast %cst_24 : f32 to vector<128x128xf32>
      %43 = arith.maximumf %41, %42 : vector<128x128xf32>
      %44 = arith.truncf %43 : vector<128x128xf32> to vector<128x128xbf16>
      %c0_25 = arith.constant 0 : index
      %c0_26 = arith.constant 0 : index
      %45 = vector.load %arg7[%c0_25, %c0_26] : memref<128x128xbf16, #tpu.memory_space<vmem>>, vector<128x128xbf16>
      tpu.vector_store %arg7[%c0_25, %c0_26], %44 {strides = array<i32>} : memref<128x128xbf16, #tpu.memory_space<vmem>>, vector<128x128xbf16>,
    } else {
    }
    return
  }
  func.func @transform_0(%arg0: i32, %arg1: i32) -> (i32, i32) {
    %c0_i32 = arith.constant 0 : i32
    return %arg0, %arg1 : i32, i32
  }
  func.func @transform_1(%arg0: i32, %arg1: i32) -> (i32, i32) {
    %c0_i32 = arith.constant 0 : i32
    %c0_i32_0 = arith.constant 0 : i32
    return %arg1, %c0_i32 : i32, i32
  }
  func.func @transform_2(%arg0: i32, %arg1: i32) -> (i32, i32) {
    %c0_i32 = arith.constant 0 : i32
    %c0_i32_0 = arith.constant 0 : i32
    %c0_i32_1 = arith.constant 0 : i32
    return %c0_i32, %c0_i32_0 : i32, i32
  }
  func.func @transform_3(%arg0: i32, %arg1: i32) -> (i32, i32) {
    %c0_i32 = arith.constant 0 : i32
    %c0_i32_0 = arith.constant 0 : i32
    %c0_i32_1 = arith.constant 0 : i32
    return %c0_i32, %c0_i32_0 : i32, i32
  }
  func.func @transform_4(%arg0: i32, %arg1: i32) -> (i32, i32) {
    %c0_i32 = arith.constant 0 : i32
    %c0_i32_0 = arith.constant 0 : i32
    %c0_i32_1 = arith.constant 0 : i32
    return %c0_i32, %c0_i32_0 : i32, i32
  }
  func.func @transform_5(%arg0: i32, %arg1: i32) -> (i32, i32) {
    %c0_i32 = arith.constant 0 : i32
    %c0_i32_0 = arith.constant 0 : i32
    return %arg0, %c0_i32 : i32, i32
  }
}

</mosaic_0001>

<bundles_post_ra>
// kernel: _gnn_forward_impl.3
= control target key start
LH: loop header
LB: loop body
LE: loop exit
PB: predicated region body
PF: predicated region fallthrough
CT: control target
= control target key end

     0   :  { %s583_s1 = inlined_call_operand.vmem [shape: bf16[128,128], index: 1, kind: input, shape index: {}]   ;;  %s584_s0 = inlined_call_operand.vmem [shape: bf16[128,128], index: 0, kind: input, shape index: {}]   ;;  %s585_s2 = inlined_call_operand.vmem [shape: bf16[128,128], index: 2, kind: output, shape index: {}]  }
   0x1   :  { %v480_v0 = vld [vmem:[%s583_s1] sm:$0xff]   ;;  %v481_v1 = vld [vmem:[%s583_s1 + $0x8] sm:$0xff]   ;;  %v482_v2 = vld [vmem:[%s583_s1 + $0x10] sm:$0xff]  }
   0x2   :  { %432 = vmatprep.subr.bf16.mxu0 %v480_v0  ;;  %464 = vmatprep.subr.bf16.mxu1 %v480_v0  ;;  %v483_v3 = vld [vmem:[%s583_s1 + $0x18] sm:$0xff]   ;;  %v488_v4 = vld [vmem:[%s584_s0] sm:$0xff]   ;;  %v485_v7 = vld [vmem:[%s583_s1 + $0x28] sm:$0xff]  }
   0x3   :  { %433 = vmatpush3.bf16.msra.mxu0 %v480_v0  ;;  %472 = vmatpush3.bf16.msra.mxu1 %v480_v0  ;;  %v489_v5 = vld [vmem:[%s584_s0 + $0x20] sm:$0xff]   ;;  %v486_v8 = vld [vmem:[%s583_s1 + $0x30] sm:$0xff]   ;;  %v487_v9 = vld [vmem:[%s583_s1 + $0x38] sm:$0xff]  }
   0x4   :  { %434 = vmatprep.subr.bf16.mxu0 %v481_v1  ;;  %465 = vmatprep.subr.bf16.mxu1 %v481_v1  ;;  %v484_v6 = vld [vmem:[%s583_s1 + $0x20] sm:$0xff]   ;;  %v490_v10 = vld [vmem:[%s584_s0 + $0x8] sm:$0xff]   ;;  %v492_v12 = vld [vmem:[%s584_s0 + $0x10] sm:$0xff]  }
   0x5   :  { %448 = vmatprep.mubr.bf16.mxu0 %v488_v4  ;;  %456 = vmatprep.mubr.bf16.mxu1 %v489_v5  ;;  %v491_v11 = vld [vmem:[%s584_s0 + $0x28] sm:$0xff]   ;;  %v493_v13 = vld [vmem:[%s584_s0 + $0x30] sm:$0xff]   ;;  %v494_v14 = vld [vmem:[%s584_s0 + $0x18] sm:$0xff]  }
   0x6   :  { %v495_v15 = vld [vmem:[%s584_s0 + $0x38] sm:$0xff]  }
   0x7   :  { %435 = vmatpush3.bf16.msra.mxu0 %v481_v1  ;;  %473 = vmatpush3.bf16.msra.mxu1 %v481_v1 }
   0x8   :  { %436 = vmatprep.subr.bf16.mxu0 %v482_v2  ;;  %466 = vmatprep.subr.bf16.mxu1 %v482_v2 }
   0xb   :  { %437 = vmatpush3.bf16.msra.mxu0 %v482_v2  ;;  %474 = vmatpush3.bf16.msra.mxu1 %v482_v2 }
   0xc   :  { %438 = vmatprep.subr.bf16.mxu0 %v483_v3  ;;  %467 = vmatprep.subr.bf16.mxu1 %v483_v3 }
   0xf   :  { %439 = vmatpush3.bf16.msra.mxu0 %v483_v3  ;;  %475 = vmatpush3.bf16.msra.mxu1 %v483_v3 }
  0x10   :  { %440 = vmatprep.subr.bf16.mxu0 %v484_v6  ;;  %468 = vmatprep.subr.bf16.mxu1 %v484_v6 }
  0x13   :  { %441 = vmatpush3.bf16.msra.mxu0 %v484_v6  ;;  %476 = vmatpush3.bf16.msra.mxu1 %v484_v6 }
  0x14   :  { %442 = vmatprep.subr.bf16.mxu0 %v485_v7  ;;  %469 = vmatprep.subr.bf16.mxu1 %v485_v7 }
  0x17   :  { %443 = vmatpush3.bf16.msra.mxu0 %v485_v7  ;;  %477 = vmatpush3.bf16.msra.mxu1 %v485_v7 }
  0x18   :  { %444 = vmatprep.subr.bf16.mxu0 %v486_v8  ;;  %470 = vmatprep.subr.bf16.mxu1 %v486_v8 }
  0x1b   :  { %445 = vmatpush3.bf16.msra.mxu0 %v486_v8  ;;  %478 = vmatpush3.bf16.msra.mxu1 %v486_v8 }
  0x1c   :  { %446 = vmatprep.subr.bf16.mxu0 %v487_v9  ;;  %471 = vmatprep.subr.bf16.mxu1 %v487_v9 }
  0x1f   :  { %447 = vmatpush3.bf16.msra.mxu0 %v487_v9  ;;  %479 = vmatpush3.bf16.msra.mxu1 %v487_v9 }
  0x22   :  { %449 = vmatmul.mubr.bf16.vlgmr.msra.gmra.mrb[0].mxu0 %v490_v10  ;;  %457 = vmatmul.mubr.bf16.vlgmr.msra.gmra.mrb[0].mxu1 %v491_v11 }
  0x23   :  { %452 = vmatprep.mubr.bf16.mxu0 %v492_v12  ;;  %460 = vmatprep.mubr.bf16.mxu1 %v493_v13 }
  0x2a   :  { %453 = vmatmul.mubr.bf16.gmra.mrb[4].mxu0 %v494_v14  ;;  %461 = vmatmul.mubr.bf16.gmra.mrb[4].mxu1 %v495_v15 }
  0xf5   :  { %v450_v16 = vpop.f32.mrb[0].mxu0  ;;  %v458_v17 = vpop.f32.mrb[0].mxu1 }
  0xf6   :  { %v174_v18 = vpop.f32.mrb[1].mxu0  ;;  %v206_v19 = vpop.f32.mrb[1].mxu1 }
  0xf7   :  { %v451_v20 = vpop.f32.mrb[2].mxu0  ;;  %v459_v21 = vpop.f32.mrb[2].mxu1 }
  0xf8   :  { %v377_v22 = vpack.c.bf16 %v451_v20, %v450_v16  ;;  %v397_v23 = vpack.c.bf16 %v459_v21, %v458_v17  ;;  %v177_v24 = vpop.f32.mrb[3].mxu0  ;;  %v209_v25 = vpop.f32.mrb[3].mxu1 }
  0xf9   :  { %v372_v26 = vpack.c.bf16 %v177_v24, %v174_v18  ;;  %v392_v27 = vpack.c.bf16 %v209_v25, %v206_v19 }
  0xfa   :  { %409 = vst [vmem:[%s585_s2 + $0x8] sm:$0xff] %v377_v22   ;;  %413 = vst [vmem:[%s585_s2 + $0x28] sm:$0xff] %v397_v23  }
  0xfb   :  { %373 = vst [vmem:[%s585_s2] sm:$0xff] %v372_v26   ;;  %412 = vst [vmem:[%s585_s2 + $0x20] sm:$0xff] %v392_v27  }
  0xfd   :  { %v454_v28 = vpop.f32.mrb[4].mxu0  ;;  %v462_v29 = vpop.f32.mrb[4].mxu1 }
  0xfe   :  { %v190_v30 = vpop.f32.mrb[5].mxu0  ;;  %v222_v31 = vpop.f32.mrb[5].mxu1 }
  0xff   :  { %v455_v32 = vpop.f32.mrb[6].mxu0  ;;  %v463_v33 = vpop.f32.mrb[6].mxu1 }
 0x100   :  { %v387_v34 = vpack.c.bf16 %v455_v32, %v454_v28  ;;  %v407_v35 = vpack.c.bf16 %v463_v33, %v462_v29  ;;  %v193_v36 = vpop.f32.mrb[7].mxu0  ;;  %v225_v37 = vpop.f32.mrb[7].mxu1 }
 0x101   :  { %v382_v38 = vpack.c.bf16 %v193_v36, %v190_v30  ;;  %v402_v39 = vpack.c.bf16 %v225_v37, %v222_v31 }
 0x102   :  { %411 = vst [vmem:[%s585_s2 + $0x18] sm:$0xff] %v387_v34   ;;  %415 = vst [vmem:[%s585_s2 + $0x38] sm:$0xff] %v407_v35  }
 0x103   :  { %410 = vst [vmem:[%s585_s2 + $0x10] sm:$0xff] %v382_v38   ;;  %414 = vst [vmem:[%s585_s2 + $0x30] sm:$0xff] %v402_v39  }

// kernel: _gnn_forward_impl.4
= control target key start
LH: loop header
LB: loop body
LE: loop exit
PB: predicated region body
PF: predicated region fallthrough
CT: control target
= control target key end

     0   :  { %s1516_s1 = inlined_call_operand.vmem [shape: bf16[128,128], index: 1, kind: input, shape index: {}]   ;;  %s1517_s0 = inlined_call_operand.vmem [shape: bf16[128,128], index: 0, kind: input, shape index: {}]   ;;  %s1518_s2 = inlined_call_operand.vmem [shape: f32[1,128], index: 2, kind: input, shape index: {}]   ;;  %s1519_s5 = inlined_call_operand.vmem [shape: bf16[128,128], index: 5, kind: input, shape index: {}]   ;;  %s1520_s3 = inlined_call_operand.vmem [shape: f32[1,128], index: 3, kind: input, shape index: {}]   ;;  %s1521_s4 = inlined_call_operand.vmem [shape: f32[1,128], index: 4, kind: input, shape index: {}]   ;;  %s1522_s6 = inlined_call_operand.vmem [shape: bf16[128,128], index: 6, kind: output, shape index: {}]  }
   0x1   :  { %v1100_v0 = vld [vmem:[%s1516_s1] sm:$0xff]   ;;  %v1101_v1 = vld [vmem:[%s1516_s1 + $0x8] sm:$0xff]   ;;  %v1102_v2 = vld [vmem:[%s1516_s1 + $0x10] sm:$0xff]  }
   0x2   :  { %1036 = vmatprep.subr.bf16.mxu0 %v1100_v0  ;;  %v1103_v3 = vld [vmem:[%s1516_s1 + $0x18] sm:$0xff]   ;;  %v1108_v4 = vld [vmem:[%s1517_s0] sm:$0xff]   ;;  %v1105_v6 = vld [vmem:[%s1516_s1 + $0x28] sm:$0xff]  }
   0x3   :  { %1037 = vmatpush3.bf16.msra.mxu0 %v1100_v0  ;;  %1052 = vmatprep.mubr.bf16.mxu0 %v1108_v4  ;;  %v1104_v5 = vld [vmem:[%s1516_s1 + $0x20] sm:$0xff]   ;;  %v1106_v7 = vld [vmem:[%s1516_s1 + $0x30] sm:$0xff]   ;;  %v1107_v8 = vld [vmem:[%s1516_s1 + $0x38] sm:$0xff]  }
   0x4   :  { %1038 = vmatprep.subr.bf16.mxu0 %v1101_v1  ;;  %v1109_v9 = vld [vmem:[%s1517_s0 + $0x8] sm:$0xff]   ;;  %v1110_v10 = vld [vmem:[%s1517_s0 + $0x10] sm:$0xff]   ;;  %v1111_v11 = vld [vmem:[%s1517_s0 + $0x18] sm:$0xff]  }
   0x5   :  { %v1112_v12 = vld [vmem:[%s1517_s0 + $0x20] sm:$0xff]   ;;  %v1113_v13 = vld [vmem:[%s1517_s0 + $0x28] sm:$0xff]   ;;  %v1114_v14 = vld [vmem:[%s1517_s0 + $0x30] sm:$0xff]  }
   0x6   :  { %v1115_v15 = vld [vmem:[%s1517_s0 + $0x38] sm:$0xff]   ;;  %v1242_v16 = vld [vmem:[%s1518_s2] ss:$0 sm:$0xff]  ;;  %v1117_v50 = vld [vmem:[%s1519_s5 + $0x8] sm:$0xff]  }
   0x7   :  { %1039 = vmatpush3.bf16.msra.mxu0 %v1101_v1  ;;  %v1116_v46 = vld [vmem:[%s1519_s5] sm:$0xff]   ;;  %v1118_v53 = vld [vmem:[%s1519_s5 + $0x10] sm:$0xff]   ;;  %v1119_v56 = vld [vmem:[%s1519_s5 + $0x18] sm:$0xff]  }
   0x8   :  { %1040 = vmatprep.subr.bf16.mxu0 %v1102_v2  ;;  %1068 = vmatprep.subr.bf16.mxu1 %v1116_v46  ;;  %v1120_v59 = vld [vmem:[%s1519_s5 + $0x20] sm:$0xff]   ;;  %v1121_v62 = vld [vmem:[%s1519_s5 + $0x28] sm:$0xff]   ;;  %v1122_v1 = vld [vmem:[%s1519_s5 + $0x30] sm:$0xff]  }
   0x9   :  { %1069 = vmatpush3.bf16.msra.mxu1 %v1116_v46  ;;  %v1123_v4 = vld [vmem:[%s1519_s5 + $0x38] sm:$0xff]  }
   0xa   :  { %1070 = vmatprep.subr.bf16.mxu1 %v1117_v50 }
   0xb   :  { %1041 = vmatpush3.bf16.msra.mxu0 %v1102_v2 }
   0xc   :  { %1042 = vmatprep.subr.bf16.mxu0 %v1103_v3 }
   0xd   :  { %1071 = vmatpush3.bf16.msra.mxu1 %v1117_v50 }
   0xe   :  { %1072 = vmatprep.subr.bf16.mxu1 %v1118_v53 }
   0xf   :  { %1043 = vmatpush3.bf16.msra.mxu0 %v1103_v3 }
  0x10   :  { %1044 = vmatprep.subr.bf16.mxu0 %v1104_v5 }
  0x11   :  { %1073 = vmatpush3.bf16.msra.mxu1 %v1118_v53 }
  0x12   :  { %1074 = vmatprep.subr.bf16.mxu1 %v1119_v56 }
  0x13   :  { %1045 = vmatpush3.bf16.msra.mxu0 %v1104_v5 }
  0x14   :  { %1046 = vmatprep.subr.bf16.mxu0 %v1105_v6 }
  0x15   :  { %1075 = vmatpush3.bf16.msra.mxu1 %v1119_v56 }
  0x16   :  { %1076 = vmatprep.subr.bf16.mxu1 %v1120_v59 }
  0x17   :  { %1047 = vmatpush3.bf16.msra.mxu0 %v1105_v6 }
  0x18   :  { %1048 = vmatprep.subr.bf16.mxu0 %v1106_v7 }
  0x19   :  { %1077 = vmatpush3.bf16.msra.mxu1 %v1120_v59 }
  0x1a   :  { %1078 = vmatprep.subr.bf16.mxu1 %v1121_v62 }
  0x1b   :  { %1049 = vmatpush3.bf16.msra.mxu0 %v1106_v7 }
  0x1c   :  { %1050 = vmatprep.subr.bf16.mxu0 %v1107_v8 }
  0x1d   :  { %1079 = vmatpush3.bf16.msra.mxu1 %v1121_v62 }
  0x1e   :  { %1080 = vmatprep.subr.bf16.mxu1 %v1122_v1 }
  0x1f   :  { %1051 = vmatpush3.bf16.msra.mxu0 %v1107_v8 }
  0x21   :  { %1081 = vmatpush3.bf16.msra.mxu1 %v1122_v1 }
  0x22   :  { %1053 = vmatmul.mubr.bf16.vlgmr.msra.gmra.mrb[0].mxu0 %v1109_v9  ;;  %1082 = vmatprep.subr.bf16.mxu1 %v1123_v4 }
  0x23   :  { %1056 = vmatprep.mubr.bf16.mxu0 %v1110_v10 }
  0x25   :  { %1083 = vmatpush3.bf16.msra.mxu1 %v1123_v4 }
  0x2a   :  { %1057 = vmatmul.mubr.bf16.gmra.mrb[4].mxu0 %v1111_v11 }
  0x2b   :  { %1060 = vmatprep.mubr.bf16.mxu0 %v1112_v12 }
  0x32   :  { %1061 = vmatmul.mubr.bf16.gmra.mrb[8].mxu0 %v1113_v13 }
  0x33   :  { %1064 = vmatprep.mubr.bf16.mxu0 %v1114_v14 }
  0x3a   :  { %1065 = vmatmul.mubr.bf16.gmra.mrb[12].mxu0 %v1115_v15 }
  0xf5   :  { %v1054_v17 = vpop.f32.mrb[0].mxu0 }
  0xf6   :  { %v1245_v18 = vadd.f32 %v1054_v17, %v1242_v16  ;;  %v222_v19 = vpop.f32.mrb[1].mxu0 }
  0xf7   :  { %v1248_v20 = vadd.f32 %v1242_v16, %v222_v19  ;;  %v1055_v21 = vpop.f32.mrb[2].mxu0 }
  0xf8   :  { %365 = vadd.xlane.f32.xlu1 %v1245_v18  ;;  %v225_v22 = vpop.f32.mrb[3].mxu0  ;;  %v1253_v23 = vadd.f32 %v1055_v21, %v1242_v16  ;;  %v395_v24 = vmul.f32 %v1245_v18, %v1245_v18 }
  0xf9   :  { %361 = vadd.xlane.f32.xlu0 %v1248_v20  ;;  %v1259_v26 = vadd.f32 %v1242_v16, %v225_v22  ;;  %v393_v32 = vmul.f32 %v1248_v20, %v1248_v20 }
  0xfa   :  { %v396_v27 = vmul.f32 %v1253_v23, %v1253_v23 }
  0xfb   :  { %v394_v31 = vmul.f32 %v1259_v26, %v1259_v26 }
  0xfc   :  { %367 = vadd.xlane.f32.xlu1 %v1253_v23 }
  0xfd   :  { %413 = vadd.xlane.f32.xlu0 %v395_v24  ;;  %v1058_v25 = vpop.f32.mrb[4].mxu0 }
  0xfe   :  { %v238_v28 = vpop.f32.mrb[5].mxu0  ;;  %v1272_v36 = vadd.f32 %v1058_v25, %v1242_v16 }
  0xff   :  { %v1059_v29 = vpop.f32.mrb[6].mxu0  ;;  %v1280_v40 = vadd.f32 %v1242_v16, %v238_v28 }
 0x100   :  { %415 = vadd.xlane.f32.xlu1 %v396_v27  ;;  %v241_v30 = vpop.f32.mrb[7].mxu0  ;;  %v1269_v33 = vadd.f32 %v1059_v29, %v1242_v16  ;;  %v399_v44 = vmul.f32 %v1272_v36, %v1272_v36 }
 0x101   :  { %363 = vadd.xlane.f32.xlu0 %v1259_v26  ;;  %v1277_v39 = vadd.f32 %v1242_v16, %v241_v30  ;;  %v397_v49 = vmul.f32 %v1280_v40, %v1280_v40 }
 0x102   :  { %v400_v42 = vmul.f32 %v1269_v33, %v1269_v33 }
 0x103   :  { %v398_v48 = vmul.f32 %v1277_v39, %v1277_v39 }
 0x104   :  { %411 = vadd.xlane.f32.xlu1 %v394_v31 }
 0x105   :  { %409 = vadd.xlane.f32.xlu0 %v393_v32  ;;  %v1062_v34 = vpop.f32.mrb[8].mxu0 }
 0x106   :  { %v254_v35 = vpop.f32.mrb[9].mxu0  ;;  %v1302_v52 = vadd.f32 %v1062_v34, %v1242_v16 }
 0x107   :  { %v1063_v37 = vpop.f32.mrb[10].mxu0  ;;  %v1313_v55 = vadd.f32 %v1242_v16, %v254_v35 }
 0x108   :  { %375 = vadd.xlane.f32.xlu1 %v1269_v33  ;;  %v257_v38 = vpop.f32.mrb[11].mxu0  ;;  %v1299_v51 = vadd.f32 %v1063_v37, %v1242_v16  ;;  %v403_v58 = vmul.f32 %v1302_v52, %v1302_v52 }
 0x109   :  { %373 = vadd.xlane.f32.xlu0 %v1272_v36  ;;  %v1310_v54 = vadd.f32 %v1242_v16, %v257_v38  ;;  %v401_v61 = vmul.f32 %v1313_v55, %v1313_v55 }
 0x10a   :  { %v404_v57 = vmul.f32 %v1299_v51, %v1299_v51 }
 0x10b   :  { %v402_v60 = vmul.f32 %v1310_v54, %v1310_v54 }
 0x10c   :  { %371 = vadd.xlane.f32.xlu1 %v1277_v39 }
 0x10d   :  { %369 = vadd.xlane.f32.xlu0 %v1280_v40  ;;  %v1066_v41 = vpop.f32.mrb[12].mxu0 }
 0x10e   :  { %v270_v43 = vpop.f32.mrb[13].mxu0  ;;  %v1338_v0 = vadd.f32 %v1066_v41, %v1242_v16 }
 0x10f   :  { %v1067_v45 = vpop.f32.mrb[14].mxu0  ;;  %v1349_v3 = vadd.f32 %v1242_v16, %v270_v43 }
 0x110   :  { %423 = vadd.xlane.f32.xlu1 %v400_v42  ;;  %v273_v47 = vpop.f32.mrb[15].mxu0  ;;  %v1335_v63 = vadd.f32 %v1067_v45, %v1242_v16  ;;  %v407_v8 = vmul.f32 %v1338_v0, %v1338_v0 }
 0x111   :  { %421 = vadd.xlane.f32.xlu0 %v399_v44  ;;  %v1346_v2 = vadd.f32 %v1242_v16, %v273_v47  ;;  %v405_v6 = vmul.f32 %v1349_v3, %v1349_v3 }
 0x112   :  { %v408_v7 = vmul.f32 %v1335_v63, %v1335_v63 }
 0x113   :  { %v406_v5 = vmul.f32 %v1346_v2, %v1346_v2 }
 0x114   :  { %419 = vadd.xlane.f32.xlu1 %v398_v48 }
 0x115   :  { %417 = vadd.xlane.f32.xlu0 %v397_v49 }
 0x118   :  { %383 = vadd.xlane.f32.xlu1 %v1299_v51 }
 0x119   :  { %381 = vadd.xlane.f32.xlu0 %v1302_v52 }
 0x11c   :  { %379 = vadd.xlane.f32.xlu1 %v1310_v54 }
 0x11d   :  { %377 = vadd.xlane.f32.xlu0 %v1313_v55 }
 0x120   :  { %431 = vadd.xlane.f32.xlu1 %v404_v57 }
 0x121   :  { %429 = vadd.xlane.f32.xlu0 %v403_v58 }
 0x124   :  { %427 = vadd.xlane.f32.xlu1 %v402_v60 }
 0x125   :  { %425 = vadd.xlane.f32.xlu0 %v401_v61 }
 0x128   :  { %391 = vadd.xlane.f32.xlu1 %v1335_v63 }
 0x129   :  { %389 = vadd.xlane.f32.xlu0 %v1338_v0 }
 0x12c   :  { %387 = vadd.xlane.f32.xlu1 %v1346_v2 }
 0x12d   :  { %385 = vadd.xlane.f32.xlu0 %v1349_v3 }
 0x130   :  { %435 = vadd.xlane.f32.xlu1 %v406_v5 }
 0x131   :  { %433 = vadd.xlane.f32.xlu0 %v405_v6 }
 0x134   :  { %439 = vadd.xlane.f32.xlu1 %v408_v7 }
 0x135   :  { %437 = vadd.xlane.f32.xlu0 %v407_v8 }
 0x185   :  { %v366_v9 = vpop.xlane.xlu1 %365 }
 0x186   :  { %v362_v10 = vpop.xlane.xlu0 %361  ;;  %v443_v11 = vmul.f32 0.03125, %v366_v9 }
 0x187   :  { %v1364_v25 = vmul.f32 0.03125, %v362_v10 }
 0x188   :  { %v475_v15 = vmul.f32 %v443_v11, %v443_v11  ;;  %v523_v61 = vsub.f32 %v1245_v18, %v443_v11 }
 0x189   :  { %v368_v12 = vpop.xlane.xlu1 %367  ;;  %v473_v38 = vmul.f32 %v1364_v25, %v1364_v25 }
 0x18a   :  { %v444_v13 = vmul.f32 0.03125, %v368_v12  ;;  %v414_v14 = vpop.xlane.xlu0 %413 }
 0x18b   :  { %v459_v16 = vmul.f32 0.03125, %v414_v14 }
 0x18c   :  { %v476_v21 = vmul.f32 %v444_v13, %v444_v13  ;;  %v524_v6 = vsub.f32 %v1253_v23, %v444_v13 }
 0x18d   :  { %v491_v17 = vsub.f32 %v459_v16, %v475_v15  ;;  %v416_v19 = vpop.xlane.xlu1 %415 }
 0x18e   :  { %v460_v22 = vmul.f32 0.03125, %v416_v19  ;;  %v364_v24 = vpop.xlane.xlu0 %363 }
 0x18f   :  { %v507_v27 = vmax.f32 %v491_v17, 0.0  ;;  %v1366_v28 = vmul.f32 0.03125, %v364_v24 }
 0x190   :  { %v492_v29 = vsub.f32 %v460_v22, %v476_v21  ;;  %v1393_v21 = vld [vmem:[%s1520_s3] ss:$0 sm:$0xff] }
 0x191   :  { %v539_v30 = vadd.f32 1e-05, %v507_v27  ;;  %v474_v31 = vmul.f32 %v1366_v28, %v1366_v28  ;;  %v412_v32 = vpop.xlane.xlu1 %411  ;;  %v522_v16 = vsub.f32 %v1259_v26, %v1366_v28  ;;  %v521_v26 = vsub.f32 %v1248_v20, %v1364_v25 }
 0x192   :  { %v508_v34 = vmax.f32 %v492_v29, 0.0  ;;  %v458_v35 = vmul.f32 0.03125, %v412_v32  ;;  %v410_v37 = vpop.xlane.xlu0 %409 }
 0x193   :  { %v457_v41 = vmul.f32 0.03125, %v410_v37  ;;  %1124 = vrsqrt.f32 %v539_v30 }
 0x194   :  { %v540_v42 = vadd.f32 1e-05, %v508_v34  ;;  %v490_v43 = vsub.f32 %v458_v35, %v474_v31 }
 0x195   :  { %v489_v44 = vsub.f32 %v457_v41, %v473_v38  ;;  %v376_v45 = vpop.xlane.xlu1 %375 }
 0x196   :  { %1126 = vrsqrt.f32 %v540_v42  ;;  %v506_v46 = vmax.f32 %v490_v43, 0.0  ;;  %v374_v47 = vpop.xlane.xlu0 %373  ;;  %v1372_v56 = vmul.f32 0.03125, %v376_v45 }
 0x197   :  { %v505_v48 = vmax.f32 %v489_v44, 0.0  ;;  %v1374_v58 = vmul.f32 0.03125, %v374_v47  ;;  %v1404_v44 = vld [vmem:[%s1521_s4] ss:$0 sm:$0xff] }
 0x198   :  { %v538_v49 = vadd.f32 1e-05, %v506_v46  ;;  %v480_v62 = vmul.f32 %v1372_v56, %v1372_v56 }
 0x199   :  { %v537_v50 = vadd.f32 1e-05, %v505_v48  ;;  %v372_v53 = vpop.xlane.xlu1 %371  ;;  %v479_v7 = vmul.f32 %v1374_v58, %v1374_v58 }
 0x19a   :  { %1128 = vrsqrt.f32 %v538_v49  ;;  %v370_v57 = vpop.xlane.xlu0 %369  ;;  %v1379_v1 = vmul.f32 0.03125, %v372_v53 }
 0x19b   :  { %1130 = vrsqrt.f32 %v537_v50  ;;  %v1384_v8 = vmul.f32 0.03125, %v370_v57 }
 0x19c   :  { %v478_v17 = vmul.f32 %v1379_v1, %v1379_v1 }
 0x19d   :  { %v424_v59 = vpop.xlane.xlu1 %423  ;;  %v1125_v60 = vpop.eup %1124  ;;  %v477_v22 = vmul.f32 %v1384_v8, %v1384_v8 }
 0x19e   :  { %v464_v4 = vmul.f32 0.03125, %v424_v59  ;;  %v422_v5 = vpop.xlane.xlu0 %421  ;;  %v571_v18 = vmul.f32 %v1125_v60, %v523_v61 }
 0x19f   :  { %v463_v9 = vmul.f32 0.03125, %v422_v5 }
 0x1a0   :  { %v1127_v10 = vpop.eup %1126  ;;  %v496_v12 = vsub.f32 %v464_v4, %v480_v62  ;;  %v593_v41 = vmul.f32 %v1393_v21, %v571_v18 }
 0x1a1   :  { %v495_v14 = vsub.f32 %v463_v9, %v479_v7  ;;  %v420_v15 = vpop.xlane.xlu1 %419  ;;  %v572_v11 = vmul.f32 %v1127_v10, %v524_v6  ;;  %v528_v7 = vsub.f32 %v1269_v33, %v1372_v56  ;;  %v527_v33 = vsub.f32 %v1272_v36, %v1374_v58 }
 0x1a2   :  { %v512_v19 = vmax.f32 %v496_v12, 0.0  ;;  %v462_v23 = vmul.f32 0.03125, %v420_v15  ;;  %v418_v13 = vpop.xlane.xlu0 %417  ;;  %v615_v57 = vadd.f32 %v1404_v44, %v593_v41 }
 0x1a3   :  { %v511_v24 = vmax.f32 %v495_v14, 0.0  ;;  %v461_v27 = vmul.f32 0.03125, %v418_v13  ;;  %v594_v29 = vmul.f32 %v1393_v21, %v572_v11 }
 0x1a4   :  { %v1129_v30 = vpop.eup %1128  ;;  %v544_v28 = vadd.f32 1e-05, %v512_v19  ;;  %v494_v31 = vsub.f32 %v462_v23, %v478_v17  ;;  %v631_v10 = vmax.f32 %v615_v57, 0.0 }
 0x1a5   :  { %v1131_v32 = vpop.eup %1130  ;;  %v543_v34 = vadd.f32 1e-05, %v511_v24  ;;  %v493_v35 = vsub.f32 %v461_v27, %v477_v22  ;;  %v384_v37 = vpop.xlane.xlu1 %383  ;;  %v570_v38 = vmul.f32 %v1129_v30, %v522_v16  ;;  %v616_v46 = vadd.f32 %v1404_v44, %v594_v29 }
 0x1a6   :  { %1132 = vrsqrt.f32 %v544_v28  ;;  %v510_v42 = vmax.f32 %v494_v31, 0.0  ;;  %v382_v43 = vpop.xlane.xlu0 %381  ;;  %v569_v45 = vmul.f32 %v1131_v32, %v521_v26  ;;  %v1411_v59 = vmul.f32 0.03125, %v384_v37 }
 0x1a7   :  { %1134 = vrsqrt.f32 %v543_v34  ;;  %v509_v20 = vmax.f32 %v493_v35, 0.0  ;;  %v592_v25 = vmul.f32 %v1393_v21, %v570_v38  ;;  %v1414_v62 = vmul.f32 0.03125, %v382_v43 }
 0x1a8   :  { %v542_v47 = vadd.f32 1e-05, %v510_v42  ;;  %v591_v48 = vmul.f32 %v1393_v21, %v569_v45  ;;  %v632_v5 = vmax.f32 %v616_v46, 0.0  ;;  %v484_v12 = vmul.f32 %v1411_v59, %v1411_v59 }
 0x1a9   :  { %v541_v49 = vadd.f32 1e-05, %v509_v20  ;;  %v380_v50 = vpop.xlane.xlu1 %379  ;;  %v614_v53 = vadd.f32 %v1404_v44, %v592_v25  ;;  %v483_v16 = vmul.f32 %v1414_v62, %v1414_v62  ;;  %v526_v24 = vsub.f32 %v1277_v39, %v1379_v1 }
 0x1aa   :  { %1136 = vrsqrt.f32 %v542_v47  ;;  %v378_v60 = vpop.xlane.xlu0 %377  ;;  %v613_v61 = vadd.f32 %v1404_v44, %v591_v48  ;;  %v1420_v14 = vmul.f32 0.03125, %v380_v50  ;;  %v646_v23 = vpack.c.bf16 %v632_v5, %v631_v10 }
 0x1ab   :  { %1138 = vrsqrt.f32 %v541_v49  ;;  %v630_v4 = vmax.f32 %v614_v53, 0.0  ;;  %v1424_v17 = vmul.f32 0.03125, %v378_v60  ;;  %v525_v39 = vsub.f32 %v1280_v40, %v1384_v8 }
 0x1ac   :  { %v629_v6 = vmax.f32 %v613_v61, 0.0  ;;  %v482_v26 = vmul.f32 %v1420_v14, %v1420_v14 }
 0x1ad   :  { %v432_v9 = vpop.xlane.xlu1 %431  ;;  %v481_v36 = vmul.f32 %v1424_v17, %v1424_v17 }
 0x1ae   :  { %v468_v15 = vmul.f32 0.03125, %v432_v9  ;;  %v430_v18 = vpop.xlane.xlu0 %429  ;;  %v645_v11 = vpack.c.bf16 %v630_v4, %v629_v6 }
 0x1af   :  { %v467_v19 = vmul.f32 0.03125, %v430_v18 }
 0x1b0   :  { %v1133_v13 = vpop.eup %1132  ;;  %v500_v56 = vsub.f32 %v468_v15, %v484_v12  ;;  %1084 = vmatprep.mubr.bf16.mxu1 %v645_v11 }
 0x1b1   :  { %v1135_v22 = vpop.eup %1134  ;;  %v499_v27 = vsub.f32 %v467_v19, %v483_v16  ;;  %1085 = vmatmul.mubr.bf16.vlgmr.msra.gmra.mrb[0].mxu1 %v646_v23  ;;  %v428_v29 = vpop.xlane.xlu1 %427  ;;  %v576_v30 = vmul.f32 %v1133_v13, %v528_v7  ;;  %v532_v16 = vsub.f32 %v1299_v51, %v1411_v59  ;;  %v531_v51 = vsub.f32 %v1302_v52, %v1414_v62 }
 0x1b2   :  { %v516_v28 = vmax.f32 %v500_v56, 0.0  ;;  %v466_v31 = vmul.f32 0.03125, %v428_v29  ;;  %v426_v32 = vpop.xlane.xlu0 %425  ;;  %v575_v34 = vmul.f32 %v1135_v22, %v527_v33 }
 0x1b3   :  { %v515_v58 = vmax.f32 %v499_v27, 0.0  ;;  %v465_v35 = vmul.f32 0.03125, %v426_v32  ;;  %v598_v37 = vmul.f32 %v1393_v21, %v576_v30 }
 0x1b4   :  { %v1137_v38 = vpop.eup %1136  ;;  %v548_v1 = vadd.f32 1e-05, %v516_v28  ;;  %v498_v41 = vsub.f32 %v466_v31, %v482_v26  ;;  %v597_v49 = vmul.f32 %v1393_v21, %v575_v34  ;;  %v530_v31 = vsub.f32 %v1310_v54, %v1420_v14 }
 0x1b5   :  { %v1139_v42 = vpop.eup %1138  ;;  %v547_v43 = vadd.f32 1e-05, %v515_v58  ;;  %v497_v45 = vsub.f32 %v465_v35, %v481_v36  ;;  %v392_v20 = vpop.xlane.xlu1 %391  ;;  %v574_v25 = vmul.f32 %v1137_v38, %v526_v24  ;;  %v620_v57 = vadd.f32 %v1404_v44, %v598_v37 }
 0x1b6   :  { %1140 = vrsqrt.f32 %v548_v1  ;;  %v514_v46 = vmax.f32 %v498_v41, 0.0  ;;  %v390_v47 = vpop.xlane.xlu0 %389  ;;  %v573_v48 = vmul.f32 %v1139_v42, %v525_v39  ;;  %v619_v9 = vadd.f32 %v1404_v44, %v597_v49 }
 0x1b7   :  { %1142 = vrsqrt.f32 %v547_v43  ;;  %v513_v50 = vmax.f32 %v497_v45, 0.0  ;;  %v596_v53 = vmul.f32 %v1393_v21, %v574_v25  ;;  %v636_v15 = vmax.f32 %v620_v57, 0.0 }
 0x1b8   :  { %v546_v40 = vadd.f32 1e-05, %v514_v46  ;;  %v595_v8 = vmul.f32 %v1393_v21, %v573_v48  ;;  %v635_v11 = vmax.f32 %v619_v9, 0.0  ;;  %v1450_v23 = vmul.f32 0.03125, %v392_v20 }
 0x1b9   :  { %v545_v60 = vadd.f32 1e-05, %v513_v50  ;;  %v388_v61 = vpop.xlane.xlu1 %387  ;;  %v618_v4 = vadd.f32 %v1404_v44, %v596_v53  ;;  %v1454_v24 = vmul.f32 0.03125, %v390_v47  ;;  %v529_v54 = vsub.f32 %v1313_v55, %v1424_v17 }
 0x1ba   :  { %1144 = vrsqrt.f32 %v546_v40  ;;  %v1442_v5 = vmul.f32 0.03125, %v388_v61  ;;  %v386_v6 = vpop.xlane.xlu0 %385  ;;  %v617_v7 = vadd.f32 %v1404_v44, %v595_v8  ;;  %v648_v30 = vpack.c.bf16 %v636_v15, %v635_v11 }
 0x1bb   :  { %1146 = vrsqrt.f32 %v545_v60  ;;  %v1446_v10 = vmul.f32 0.03125, %v386_v6  ;;  %v634_v12 = vmax.f32 %v618_v4, 0.0  ;;  %v488_v58 = vmul.f32 %v1450_v23, %v1450_v23 }
 0x1bc   :  { %v633_v18 = vmax.f32 %v617_v7, 0.0  ;;  %v486_v13 = vmul.f32 %v1442_v5, %v1442_v5  ;;  %v487_v52 = vmul.f32 %v1454_v24, %v1454_v24  ;;  %v534_v15 = vsub.f32 %v1346_v2, %v1442_v5 }
 0x1bd   :  { %v436_v19 = vpop.xlane.xlu1 %435  ;;  %v485_v27 = vmul.f32 %v1446_v10, %v1446_v10 }
 0x1be   :  { %v470_v33 = vmul.f32 0.03125, %v436_v19  ;;  %v434_v56 = vpop.xlane.xlu0 %433  ;;  %v647_v22 = vpack.c.bf16 %v634_v12, %v633_v18 }
 0x1bf   :  { %v469_v29 = vmul.f32 0.03125, %v434_v56  ;;  %v536_v56 = vsub.f32 %v1335_v63, %v1450_v23 }
 0x1c0   :  { %v1141_v26 = vpop.eup %1140  ;;  %v502_v59 = vsub.f32 %v470_v33, %v486_v13  ;;  %1088 = vmatprep.mubr.bf16.mxu1 %v647_v22 }
 0x1c1   :  { %v1143_v28 = vpop.eup %1142  ;;  %v501_v32 = vsub.f32 %v469_v29, %v485_v27  ;;  %1089 = vmatmul.mubr.bf16.gmra.mrb[4].mxu1 %v648_v30  ;;  %v440_v34 = vpop.xlane.xlu1 %439  ;;  %v580_v36 = vmul.f32 %v1141_v26, %v532_v16  ;;  %v533_v16 = vsub.f32 %v1349_v3, %v1446_v10  ;;  %v535_v29 = vsub.f32 %v1338_v0, %v1454_v24 }
 0x1c2   :  { %v518_v35 = vmax.f32 %v502_v59, 0.0  ;;  %v472_v37 = vmul.f32 0.03125, %v440_v34  ;;  %v438_v38 = vpop.xlane.xlu0 %437  ;;  %v579_v39 = vmul.f32 %v1143_v28, %v531_v51 }
 0x1c3   :  { %v517_v62 = vmax.f32 %v501_v32, 0.0  ;;  %v471_v1 = vmul.f32 0.03125, %v438_v38  ;;  %v602_v41 = vmul.f32 %v1393_v21, %v580_v36 }
 0x1c4   :  { %v1145_v42 = vpop.eup %1144  ;;  %v550_v14 = vadd.f32 1e-05, %v518_v35  ;;  %v504_v43 = vsub.f32 %v472_v37, %v488_v58  ;;  %v601_v45 = vmul.f32 %v1393_v21, %v579_v39 }
 0x1c5   :  { %v1147_v20 = vpop.eup %1146  ;;  %v549_v25 = vadd.f32 1e-05, %v517_v62  ;;  %v503_v46 = vsub.f32 %v471_v1, %v487_v52  ;;  %v578_v47 = vmul.f32 %v1145_v42, %v530_v31  ;;  %v624_v50 = vadd.f32 %v1404_v44, %v602_v41 }
 0x1c6   :  { %1148 = vrsqrt.f32 %v550_v14  ;;  %v520_v48 = vmax.f32 %v504_v43, 0.0  ;;  %v577_v49 = vmul.f32 %v1147_v20, %v529_v54  ;;  %v623_v40 = vadd.f32 %v1404_v44, %v601_v45 }
 0x1c7   :  { %1150 = vrsqrt.f32 %v549_v25  ;;  %v519_v53 = vmax.f32 %v503_v46, 0.0  ;;  %v600_v57 = vmul.f32 %v1393_v21, %v578_v47  ;;  %v640_v7 = vmax.f32 %v624_v50, 0.0 }
 0x1c8   :  { %v552_v55 = vadd.f32 1e-05, %v520_v48  ;;  %v599_v17 = vmul.f32 %v1393_v21, %v577_v49  ;;  %v639_v6 = vmax.f32 %v623_v40, 0.0 }
 0x1c9   :  { %v551_v8 = vadd.f32 1e-05, %v519_v53  ;;  %v622_v60 = vadd.f32 %v1404_v44, %v600_v57 }
 0x1ca   :  { %1152 = vrsqrt.f32 %v552_v55  ;;  %v621_v61 = vadd.f32 %v1404_v44, %v599_v17  ;;  %v650_v18 = vpack.c.bf16 %v640_v7, %v639_v6 }
 0x1cb   :  { %1154 = vrsqrt.f32 %v551_v8  ;;  %v638_v4 = vmax.f32 %v622_v60, 0.0 }
 0x1cc   :  { %v637_v9 = vmax.f32 %v621_v61, 0.0 }
 0x1ce   :  { %v649_v12 = vpack.c.bf16 %v638_v4, %v637_v9 }
 0x1d0   :  { %v1149_v11 = vpop.eup %1148  ;;  %1092 = vmatprep.mubr.bf16.mxu1 %v649_v12 }
 0x1d1   :  { %v1151_v19 = vpop.eup %1150  ;;  %1093 = vmatmul.mubr.bf16.gmra.mrb[8].mxu1 %v650_v18  ;;  %v582_v13 = vmul.f32 %v1149_v11, %v534_v15 }
 0x1d2   :  { %v581_v33 = vmul.f32 %v1151_v19, %v533_v16 }
 0x1d3   :  { %v604_v22 = vmul.f32 %v1393_v21, %v582_v13 }
 0x1d4   :  { %v1153_v27 = vpop.eup %1152  ;;  %v603_v2 = vmul.f32 %v1393_v21, %v581_v33 }
 0x1d5   :  { %v1155_v5 = vpop.eup %1154  ;;  %v626_v30 = vadd.f32 %v1404_v44, %v604_v22  ;;  %v584_v3 = vmul.f32 %v1153_v27, %v536_v56 }
 0x1d6   :  { %v625_v10 = vadd.f32 %v1404_v44, %v603_v2  ;;  %v583_v26 = vmul.f32 %v1155_v5, %v535_v29 }
 0x1d7   :  { %v642_v51 = vmax.f32 %v626_v30, 0.0  ;;  %v606_v59 = vmul.f32 %v1393_v21, %v584_v3 }
 0x1d8   :  { %v641_v28 = vmax.f32 %v625_v10, 0.0  ;;  %v605_v63 = vmul.f32 %v1393_v21, %v583_v26 }
 0x1d9   :  { %v628_v23 = vadd.f32 %v1404_v44, %v606_v59 }
 0x1da   :  { %v651_v31 = vpack.c.bf16 %v642_v51, %v641_v28  ;;  %v627_v0 = vadd.f32 %v1404_v44, %v605_v63 }
 0x1db   :  { %v644_v24 = vmax.f32 %v628_v23, 0.0 }
 0x1dc   :  { %1096 = vmatprep.mubr.bf16.mxu1 %v651_v31  ;;  %v643_v32 = vmax.f32 %v627_v0, 0.0 }
 0x1de   :  { %v652_v34 = vpack.c.bf16 %v644_v24, %v643_v32 }
 0x1e0   :  { %1097 = vmatmul.mubr.bf16.gmra.mrb[12].mxu1 %v652_v34 }
 0x284   :  { %v1086_v36 = vpop.f32.mrb[0].mxu1 }
 0x285   :  { %v751_v58 = vpop.f32.mrb[1].mxu1 }
 0x286   :  { %v1087_v35 = vpop.f32.mrb[2].mxu1 }
 0x287   :  { %v965_v37 = vpack.c.bf16 %v1087_v35, %v1086_v36  ;;  %v754_v38 = vpop.f32.mrb[3].mxu1 }
 0x288   :  { %v960_v39 = vpack.c.bf16 %v754_v38, %v751_v58 }
 0x289   :  { %997 = vst [vmem:[%s1522_s6 + $0x8] sm:$0xff] %v965_v37  }
 0x28a   :  { %961 = vst [vmem:[%s1522_s6] sm:$0xff] %v960_v39  }
 0x294   :  { %v1090_v21 = vpop.f32.mrb[4].mxu1 }
 0x295   :  { %v767_v44 = vpop.f32.mrb[5].mxu1 }
 0x296   :  { %v1091_v52 = vpop.f32.mrb[6].mxu1 }
 0x297   :  { %v975_v62 = vpack.c.bf16 %v1091_v52, %v1090_v21  ;;  %v770_v1 = vpop.f32.mrb[7].mxu1 }
 0x298   :  { %v970_v41 = vpack.c.bf16 %v770_v1, %v767_v44 }
 0x299   :  { %999 = vst [vmem:[%s1522_s6 + $0x18] sm:$0xff] %v975_v62  }
 0x29a   :  { %998 = vst [vmem:[%s1522_s6 + $0x10] sm:$0xff] %v970_v41  }
 0x2a4   :  { %v1094_v42 = vpop.f32.mrb[8].mxu1 }
 0x2a5   :  { %v783_v54 = vpop.f32.mrb[9].mxu1 }
 0x2a6   :  { %v1095_v14 = vpop.f32.mrb[10].mxu1 }
 0x2a7   :  { %v985_v43 = vpack.c.bf16 %v1095_v14, %v1094_v42  ;;  %v786_v45 = vpop.f32.mrb[11].mxu1 }
 0x2a8   :  { %v980_v20 = vpack.c.bf16 %v786_v45, %v783_v54 }
 0x2a9   :  { %1001 = vst [vmem:[%s1522_s6 + $0x28] sm:$0xff] %v985_v43  }
 0x2aa   :  { %1000 = vst [vmem:[%s1522_s6 + $0x20] sm:$0xff] %v980_v20  }
 0x2b3   :  { %v1098_v25 = vpop.f32.mrb[12].mxu1 }
 0x2b4   :  { %v799_v46 = vpop.f32.mrb[13].mxu1 }
 0x2b5   :  { %v1099_v47 = vpop.f32.mrb[14].mxu1 }
 0x2b6   :  { %v995_v48 = vpack.c.bf16 %v1099_v47, %v1098_v25  ;;  %v802_v49 = vpop.f32.mrb[15].mxu1 }
 0x2b7   :  { %v990_v50 = vpack.c.bf16 %v802_v49, %v799_v46 }
 0x2b8   :  { %1003 = vst [vmem:[%s1522_s6 + $0x38] sm:$0xff] %v995_v48  }
 0x2b9   :  { %1002 = vst [vmem:[%s1522_s6 + $0x30] sm:$0xff] %v990_v50  }

// kernel: _gnn_forward_impl.5
= control target key start
LH: loop header
LB: loop body
LE: loop exit
PB: predicated region body
PF: predicated region fallthrough
CT: control target
= control target key end

     0   :  { %s1260_s1 = inlined_call_operand.vmem [shape: bf16[128,128], index: 1, kind: input, shape index: {}]   ;;  %s1261_s0 = inlined_call_operand.vmem [shape: bf16[128,128], index: 0, kind: input, shape index: {}]   ;;  %s1262_s2 = inlined_call_operand.vmem [shape: f32[1,128], index: 2, kind: input, shape index: {}]   ;;  %s1263_s3 = inlined_call_operand.vmem [shape: f32[1,128], index: 3, kind: input, shape index: {}]   ;;  %s1264_s4 = inlined_call_operand.vmem [shape: f32[1,128], index: 4, kind: input, shape index: {}]   ;;  %s1265_s5 = inlined_call_operand.vmem [shape: bf16[128,128], index: 5, kind: output, shape index: {}]  }
   0x1   :  { %v888_v0 = vld [vmem:[%s1260_s1] sm:$0xff]   ;;  %v889_v1 = vld [vmem:[%s1260_s1 + $0x8] sm:$0xff]   ;;  %v890_v2 = vld [vmem:[%s1260_s1 + $0x10] sm:$0xff]  }
   0x2   :  { %840 = vmatprep.subr.bf16.mxu0 %v888_v0  ;;  %872 = vmatprep.subr.bf16.mxu1 %v888_v0  ;;  %v891_v3 = vld [vmem:[%s1260_s1 + $0x18] sm:$0xff]   ;;  %v896_v4 = vld [vmem:[%s1261_s0] sm:$0xff]   ;;  %v893_v7 = vld [vmem:[%s1260_s1 + $0x28] sm:$0xff]  }
   0x3   :  { %841 = vmatpush3.bf16.msra.mxu0 %v888_v0  ;;  %880 = vmatpush3.bf16.msra.mxu1 %v888_v0  ;;  %v897_v5 = vld [vmem:[%s1261_s0 + $0x20] sm:$0xff]   ;;  %v894_v8 = vld [vmem:[%s1260_s1 + $0x30] sm:$0xff]   ;;  %v895_v9 = vld [vmem:[%s1260_s1 + $0x38] sm:$0xff]  }
   0x4   :  { %842 = vmatprep.subr.bf16.mxu0 %v889_v1  ;;  %873 = vmatprep.subr.bf16.mxu1 %v889_v1  ;;  %v892_v6 = vld [vmem:[%s1260_s1 + $0x20] sm:$0xff]   ;;  %v898_v10 = vld [vmem:[%s1261_s0 + $0x8] sm:$0xff]   ;;  %v900_v12 = vld [vmem:[%s1261_s0 + $0x10] sm:$0xff]  }
   0x5   :  { %856 = vmatprep.mubr.bf16.mxu0 %v896_v4  ;;  %864 = vmatprep.mubr.bf16.mxu1 %v897_v5  ;;  %v899_v11 = vld [vmem:[%s1261_s0 + $0x28] sm:$0xff]   ;;  %v902_v13 = vld [vmem:[%s1261_s0 + $0x30] sm:$0xff]   ;;  %v901_v14 = vld [vmem:[%s1261_s0 + $0x18] sm:$0xff]  }
   0x6   :  { %v903_v15 = vld [vmem:[%s1261_s0 + $0x38] sm:$0xff]   ;;  %v742_v16 = vld [vmem:[%s1262_s2] ss:$0 sm:$0xff] }
   0x7   :  { %843 = vmatpush3.bf16.msra.mxu0 %v889_v1  ;;  %881 = vmatpush3.bf16.msra.mxu1 %v889_v1 }
   0x8   :  { %844 = vmatprep.subr.bf16.mxu0 %v890_v2  ;;  %874 = vmatprep.subr.bf16.mxu1 %v890_v2 }
   0xb   :  { %845 = vmatpush3.bf16.msra.mxu0 %v890_v2  ;;  %882 = vmatpush3.bf16.msra.mxu1 %v890_v2 }
   0xc   :  { %846 = vmatprep.subr.bf16.mxu0 %v891_v3  ;;  %875 = vmatprep.subr.bf16.mxu1 %v891_v3 }
   0xf   :  { %847 = vmatpush3.bf16.msra.mxu0 %v891_v3  ;;  %883 = vmatpush3.bf16.msra.mxu1 %v891_v3 }
  0x10   :  { %848 = vmatprep.subr.bf16.mxu0 %v892_v6  ;;  %876 = vmatprep.subr.bf16.mxu1 %v892_v6 }
  0x13   :  { %849 = vmatpush3.bf16.msra.mxu0 %v892_v6  ;;  %884 = vmatpush3.bf16.msra.mxu1 %v892_v6 }
  0x14   :  { %850 = vmatprep.subr.bf16.mxu0 %v893_v7  ;;  %877 = vmatprep.subr.bf16.mxu1 %v893_v7 }
  0x17   :  { %851 = vmatpush3.bf16.msra.mxu0 %v893_v7  ;;  %885 = vmatpush3.bf16.msra.mxu1 %v893_v7 }
  0x18   :  { %852 = vmatprep.subr.bf16.mxu0 %v894_v8  ;;  %878 = vmatprep.subr.bf16.mxu1 %v894_v8 }
  0x1b   :  { %853 = vmatpush3.bf16.msra.mxu0 %v894_v8  ;;  %886 = vmatpush3.bf16.msra.mxu1 %v894_v8 }
  0x1c   :  { %854 = vmatprep.subr.bf16.mxu0 %v895_v9  ;;  %879 = vmatprep.subr.bf16.mxu1 %v895_v9 }
  0x1f   :  { %855 = vmatpush3.bf16.msra.mxu0 %v895_v9  ;;  %887 = vmatpush3.bf16.msra.mxu1 %v895_v9 }
  0x22   :  { %857 = vmatmul.mubr.bf16.vlgmr.msra.gmra.mrb[0].mxu0 %v898_v10  ;;  %865 = vmatmul.mubr.bf16.vlgmr.msra.gmra.mrb[0].mxu1 %v899_v11 }
  0x23   :  { %860 = vmatprep.mubr.bf16.mxu0 %v900_v12  ;;  %868 = vmatprep.mubr.bf16.mxu1 %v902_v13 }
  0x2a   :  { %861 = vmatmul.mubr.bf16.gmra.mrb[4].mxu0 %v901_v14  ;;  %869 = vmatmul.mubr.bf16.gmra.mrb[4].mxu1 %v903_v15 }
  0xf5   :  { %v858_v17 = vpop.f32.mrb[0].mxu0  ;;  %v866_v18 = vpop.f32.mrb[0].mxu1 }
  0xf6   :  { %v1017_v19 = vadd.f32 %v858_v17, %v742_v16  ;;  %v1019_v20 = vadd.f32 %v866_v18, %v742_v16  ;;  %v219_v21 = vpop.f32.mrb[1].mxu0  ;;  %v251_v22 = vpop.f32.mrb[1].mxu1 }
  0xf7   :  { %v859_v23 = vpop.f32.mrb[2].mxu0  ;;  %v867_v24 = vpop.f32.mrb[2].mxu1  ;;  %v1023_v27 = vadd.f32 %v742_v16, %v219_v21  ;;  %v1029_v31 = vadd.f32 %v742_v16, %v251_v22 }
  0xf8   :  { %378 = vadd.xlane.f32.xlu0 %v1019_v20  ;;  %v254_v25 = vpop.f32.mrb[3].mxu1  ;;  %362 = vadd.xlane.f32.xlu1 %v1017_v19  ;;  %v222_v26 = vpop.f32.mrb[3].mxu0  ;;  %v1025_v28 = vadd.f32 %v859_v23, %v742_v16  ;;  %v1031_v32 = vadd.f32 %v867_v24, %v742_v16  ;;  %v392_v40 = vmul.f32 %v1017_v19, %v1017_v19 }
  0xf9   :  { %v1035_v39 = vadd.f32 %v742_v16, %v254_v25  ;;  %v400_v41 = vmul.f32 %v1019_v20, %v1019_v20  ;;  %v1044_v43 = vadd.f32 %v742_v16, %v222_v26  ;;  %v390_v45 = vmul.f32 %v1023_v27, %v1023_v27 }
  0xfa   :  { %v393_v42 = vmul.f32 %v1025_v28, %v1025_v28  ;;  %v401_v44 = vmul.f32 %v1031_v32, %v1031_v32  ;;  %v398_v47 = vmul.f32 %v1029_v31, %v1029_v31 }
  0xfb   :  { %v391_v46 = vmul.f32 %v1044_v43, %v1044_v43  ;;  %v399_v48 = vmul.f32 %v1035_v39, %v1035_v39 }
  0xfc   :  { %358 = vadd.xlane.f32.xlu0 %v1023_v27  ;;  %364 = vadd.xlane.f32.xlu1 %v1025_v28 }
  0xfd   :  { %v862_v29 = vpop.f32.mrb[4].mxu0  ;;  %v870_v30 = vpop.f32.mrb[4].mxu1 }
  0xfe   :  { %v235_v33 = vpop.f32.mrb[5].mxu0  ;;  %v267_v34 = vpop.f32.mrb[5].mxu1  ;;  %v1057_v49 = vadd.f32 %v862_v29, %v742_v16  ;;  %v1063_v51 = vadd.f32 %v870_v30, %v742_v16 }
  0xff   :  { %v863_v35 = vpop.f32.mrb[6].mxu0  ;;  %v871_v36 = vpop.f32.mrb[6].mxu1  ;;  %v1069_v53 = vadd.f32 %v742_v16, %v235_v33  ;;  %v1075_v55 = vadd.f32 %v742_v16, %v267_v34 }
 0x100   :  { %374 = vadd.xlane.f32.xlu0 %v1029_v31  ;;  %380 = vadd.xlane.f32.xlu1 %v1031_v32  ;;  %v238_v37 = vpop.f32.mrb[7].mxu0  ;;  %v270_v38 = vpop.f32.mrb[7].mxu1  ;;  %v1059_v50 = vadd.f32 %v863_v35, %v742_v16  ;;  %v1065_v52 = vadd.f32 %v871_v36, %v742_v16  ;;  %v396_v57 = vmul.f32 %v1057_v49, %v1057_v49 }
 0x101   :  { %v1071_v54 = vadd.f32 %v742_v16, %v238_v37  ;;  %v1077_v56 = vadd.f32 %v742_v16, %v270_v38  ;;  %v394_v59 = vmul.f32 %v1069_v53, %v1069_v53  ;;  %v402_v61 = vmul.f32 %v1075_v55, %v1075_v55 }
 0x102   :  { %v397_v58 = vmul.f32 %v1059_v50, %v1059_v50  ;;  %v404_v63 = vmul.f32 %v1063_v51, %v1063_v51  ;;  %v405_v0 = vmul.f32 %v1065_v52, %v1065_v52 }
 0x103   :  { %v395_v60 = vmul.f32 %v1071_v54, %v1071_v54  ;;  %v403_v62 = vmul.f32 %v1077_v56, %v1077_v56 }
 0x104   :  { %410 = vadd.xlane.f32.xlu0 %v392_v40  ;;  %376 = vadd.xlane.f32.xlu1 %v1035_v39 }
 0x108   :  { %426 = vadd.xlane.f32.xlu0 %v400_v41  ;;  %412 = vadd.xlane.f32.xlu1 %v393_v42 }
 0x10c   :  { %428 = vadd.xlane.f32.xlu1 %v401_v44  ;;  %360 = vadd.xlane.f32.xlu0 %v1044_v43 }
 0x110   :  { %406 = vadd.xlane.f32.xlu0 %v390_v45  ;;  %408 = vadd.xlane.f32.xlu1 %v391_v46 }
 0x114   :  { %422 = vadd.xlane.f32.xlu0 %v398_v47  ;;  %424 = vadd.xlane.f32.xlu1 %v399_v48 }
 0x118   :  { %370 = vadd.xlane.f32.xlu0 %v1057_v49  ;;  %372 = vadd.xlane.f32.xlu1 %v1059_v50 }
 0x11c   :  { %386 = vadd.xlane.f32.xlu0 %v1063_v51  ;;  %388 = vadd.xlane.f32.xlu1 %v1065_v52 }
 0x120   :  { %366 = vadd.xlane.f32.xlu0 %v1069_v53  ;;  %368 = vadd.xlane.f32.xlu1 %v1071_v54 }
 0x124   :  { %382 = vadd.xlane.f32.xlu0 %v1075_v55  ;;  %384 = vadd.xlane.f32.xlu1 %v1077_v56 }
 0x128   :  { %418 = vadd.xlane.f32.xlu0 %v396_v57  ;;  %420 = vadd.xlane.f32.xlu1 %v397_v58 }
 0x12c   :  { %414 = vadd.xlane.f32.xlu0 %v394_v59  ;;  %416 = vadd.xlane.f32.xlu1 %v395_v60 }
 0x130   :  { %430 = vadd.xlane.f32.xlu0 %v402_v61  ;;  %432 = vadd.xlane.f32.xlu1 %v403_v62 }
 0x134   :  { %434 = vadd.xlane.f32.xlu0 %v404_v63  ;;  %436 = vadd.xlane.f32.xlu1 %v405_v0 }
 0x185   :  { %v379_v1 = vpop.xlane.xlu0 %378  ;;  %v363_v2 = vpop.xlane.xlu1 %362 }
 0x186   :  { %v440_v7 = vmul.f32 0.03125, %v363_v2  ;;  %v1097_v8 = vmul.f32 0.03125, %v379_v1 }
 0x188   :  { %v472_v11 = vmul.f32 %v440_v7, %v440_v7  ;;  %v480_v15 = vmul.f32 %v1097_v8, %v1097_v8 }
 0x189   :  { %v359_v3 = vpop.xlane.xlu0 %358  ;;  %v365_v4 = vpop.xlane.xlu1 %364 }
 0x18a   :  { %v1099_v12 = vmul.f32 0.03125, %v365_v4  ;;  %v1107_v30 = vmul.f32 0.03125, %v359_v3 }
 0x18c   :  { %v473_v21 = vmul.f32 %v1099_v12, %v1099_v12  ;;  %v470_v45 = vmul.f32 %v1107_v30, %v1107_v30 }
 0x18d   :  { %v375_v5 = vpop.xlane.xlu0 %374  ;;  %v381_v6 = vpop.xlane.xlu1 %380 }
 0x18e   :  { %v1103_v16 = vmul.f32 0.03125, %v381_v6  ;;  %v1115_v46 = vmul.f32 0.03125, %v375_v5 }
 0x190   :  { %v481_v33 = vmul.f32 %v1103_v16, %v1103_v16  ;;  %v478_v1 = vmul.f32 %v1115_v46, %v1115_v46 }
 0x191   :  { %v411_v9 = vpop.xlane.xlu0 %410  ;;  %v377_v10 = vpop.xlane.xlu1 %376 }
 0x192   :  { %v456_v13 = vmul.f32 0.03125, %v411_v9  ;;  %v1119_v61 = vmul.f32 0.03125, %v377_v10  ;;  %v520_v9 = vsub.f32 %v1017_v19, %v440_v7  ;;  %v528_v19 = vsub.f32 %v1019_v20, %v1097_v8 }
 0x194   :  { %v488_v14 = vsub.f32 %v456_v13, %v472_v11  ;;  %v479_v11 = vmul.f32 %v1119_v61, %v1119_v61 }
 0x195   :  { %v427_v17 = vpop.xlane.xlu0 %426  ;;  %v413_v18 = vpop.xlane.xlu1 %412 }
 0x196   :  { %v504_v22 = vmax.f32 %v488_v14, 0.0  ;;  %v464_v23 = vmul.f32 0.03125, %v427_v17  ;;  %v457_v24 = vmul.f32 0.03125, %v413_v18  ;;  %v1129_v18 = vld [vmem:[%s1263_s3] ss:$0 sm:$0xff] }
 0x198   :  { %v536_v25 = vadd.f32 1e-05, %v504_v22  ;;  %v496_v26 = vsub.f32 %v464_v23, %v480_v15  ;;  %v489_v29 = vsub.f32 %v457_v24, %v473_v21 }
 0x199   :  { %v429_v34 = vpop.xlane.xlu1 %428  ;;  %v361_v35 = vpop.xlane.xlu0 %360 }
 0x19a   :  { %904 = vrsqrt.f32 %v536_v25  ;;  %v512_v36 = vmax.f32 %v496_v26, 0.0  ;;  %v505_v37 = vmax.f32 %v489_v29, 0.0  ;;  %v465_v38 = vmul.f32 0.03125, %v429_v34 }
 0x19b   :  { %v1111_v40 = vmul.f32 0.03125, %v361_v35  ;;  %v521_v29 = vsub.f32 %v1025_v28, %v1099_v12  ;;  %v529_v28 = vsub.f32 %v1031_v32, %v1103_v16 }
 0x19c   :  { %v544_v41 = vadd.f32 1e-05, %v512_v36  ;;  %v537_v42 = vadd.f32 1e-05, %v505_v37  ;;  %v497_v44 = vsub.f32 %v465_v38, %v481_v33  ;;  %v1139_v36 = vld [vmem:[%s1264_s4] ss:$0 sm:$0xff] }
 0x19d   :  { %v471_v47 = vmul.f32 %v1111_v40, %v1111_v40  ;;  %v407_v48 = vpop.xlane.xlu0 %406  ;;  %v409_v57 = vpop.xlane.xlu1 %408  ;;  %v519_v16 = vsub.f32 %v1044_v43, %v1111_v40 }
 0x19e   :  { %906 = vrsqrt.f32 %v544_v41  ;;  %v513_v58 = vmax.f32 %v497_v44, 0.0  ;;  %v454_v59 = vmul.f32 0.03125, %v407_v48  ;;  %v455_v60 = vmul.f32 0.03125, %v409_v57 }
 0x19f   :  { %908 = vrsqrt.f32 %v537_v42 }
 0x1a0   :  { %v545_v62 = vadd.f32 1e-05, %v513_v58  ;;  %v486_v63 = vsub.f32 %v454_v59, %v470_v45  ;;  %v487_v0 = vsub.f32 %v455_v60, %v471_v47  ;;  %v518_v59 = vsub.f32 %v1023_v27, %v1107_v30 }
 0x1a1   :  { %v423_v2 = vpop.xlane.xlu0 %422  ;;  %v425_v3 = vpop.xlane.xlu1 %424 }
 0x1a2   :  { %910 = vrsqrt.f32 %v545_v62  ;;  %v502_v4 = vmax.f32 %v486_v63, 0.0  ;;  %v503_v5 = vmax.f32 %v487_v0, 0.0  ;;  %v462_v6 = vmul.f32 0.03125, %v423_v2 }
 0x1a3   :  { %v463_v10 = vmul.f32 0.03125, %v425_v3 }
 0x1a4   :  { %v905_v13 = vpop.eup %904  ;;  %v534_v14 = vadd.f32 1e-05, %v502_v4  ;;  %v535_v15 = vadd.f32 1e-05, %v503_v5  ;;  %v494_v17 = vsub.f32 %v462_v6, %v478_v1 }
 0x1a5   :  { %v568_v21 = vmul.f32 %v905_v13, %v520_v9  ;;  %v495_v22 = vsub.f32 %v463_v10, %v479_v11  ;;  %v371_v23 = vpop.xlane.xlu0 %370  ;;  %v373_v24 = vpop.xlane.xlu1 %372  ;;  %v526_v11 = vsub.f32 %v1029_v31, %v1115_v46 }
 0x1a6   :  { %912 = vrsqrt.f32 %v534_v14  ;;  %v510_v25 = vmax.f32 %v494_v17, 0.0  ;;  %v1157_v1 = vmul.f32 0.03125, %v371_v23  ;;  %v1159_v2 = vmul.f32 0.03125, %v373_v24 }
 0x1a7   :  { %914 = vrsqrt.f32 %v535_v15  ;;  %v511_v7 = vmax.f32 %v495_v22, 0.0  ;;  %v590_v33 = vmul.f32 %v1129_v18, %v568_v21  ;;  %v527_v14 = vsub.f32 %v1035_v39, %v1119_v61 }
 0x1a8   :  { %v907_v26 = vpop.eup %906  ;;  %v542_v34 = vadd.f32 1e-05, %v510_v25  ;;  %v476_v17 = vmul.f32 %v1157_v1, %v1157_v1  ;;  %v477_v31 = vmul.f32 %v1159_v2, %v1159_v2 }
 0x1a9   :  { %v909_v35 = vpop.eup %908  ;;  %v576_v37 = vmul.f32 %v907_v26, %v528_v19  ;;  %v543_v38 = vadd.f32 1e-05, %v511_v7  ;;  %v1141_v41 = vpop.xlane.xlu0 %386  ;;  %v612_v44 = vadd.f32 %v1139_v36, %v590_v33 }
 0x1aa   :  { %v1143_v20 = vpop.xlane.xlu1 %388  ;;  %v569_v8 = vmul.f32 %v909_v35, %v521_v29  ;;  %916 = vrsqrt.f32 %v542_v34 }
 0x1ab   :  { %v598_v12 = vmul.f32 %v1129_v18, %v576_v37  ;;  %918 = vrsqrt.f32 %v543_v38  ;;  %v628_v63 = vmax.f32 %v612_v44, 0.0 }
 0x1ac   :  { %v911_v42 = vpop.eup %910  ;;  %v591_v45 = vmul.f32 %v1129_v18, %v569_v8 }
 0x1ad   :  { %v577_v47 = vmul.f32 %v911_v42, %v529_v28  ;;  %v367_v48 = vpop.xlane.xlu0 %366  ;;  %v620_v60 = vadd.f32 %v1139_v36, %v598_v12 }
 0x1ae   :  { %v369_v57 = vpop.xlane.xlu1 %368  ;;  %v613_v58 = vadd.f32 %v1139_v36, %v591_v45  ;;  %v1176_v24 = vmul.f32 0.03125, %v367_v48 }
 0x1af   :  { %v599_v32 = vmul.f32 %v1129_v18, %v577_v47  ;;  %v636_v10 = vmax.f32 %v620_v60, 0.0  ;;  %v1183_v34 = vmul.f32 0.03125, %v369_v57 }
 0x1b0   :  { %v913_v62 = vpop.eup %912  ;;  %v629_v0 = vmax.f32 %v613_v58, 0.0  ;;  %v474_v12 = vmul.f32 %v1176_v24, %v1176_v24 }
 0x1b1   :  { %v915_v3 = vpop.eup %914  ;;  %v621_v4 = vadd.f32 %v1139_v36, %v599_v32  ;;  %v566_v5 = vmul.f32 %v913_v62, %v518_v59  ;;  %v383_v6 = vpop.xlane.xlu0 %382  ;;  %v475_v32 = vmul.f32 %v1183_v34, %v1183_v34 }
 0x1b2   :  { %v385_v27 = vpop.xlane.xlu1 %384  ;;  %v785_v30 = vpack.c.bf16 %v629_v0, %v628_v63  ;;  %v567_v9 = vmul.f32 %v915_v3, %v519_v16  ;;  %v1189_v42 = vmul.f32 0.03125, %v383_v6  ;;  %v1200_v0 = vmul.f32 0.03125, %v1141_v41 }
 0x1b3   :  { %v637_v43 = vmax.f32 %v621_v4, 0.0  ;;  %v588_v40 = vmul.f32 %v1129_v18, %v566_v5  ;;  %v1191_v44 = vmul.f32 0.03125, %v385_v27 }
 0x1b4   :  { %v917_v13 = vpop.eup %916  ;;  %817 = vst [vmem:[%s1265_s5 + $0x8] sm:$0xff] %v785_v30   ;;  %v589_v15 = vmul.f32 %v1129_v18, %v567_v9  ;;  %v482_v5 = vmul.f32 %v1189_v42, %v1189_v42 }
 0x1b5   :  { %v919_v46 = vpop.eup %918  ;;  %v805_v21 = vpack.c.bf16 %v637_v43, %v636_v10  ;;  %v610_v22 = vadd.f32 %v1139_v36, %v588_v40  ;;  %v574_v23 = vmul.f32 %v917_v13, %v526_v11  ;;  %v419_v39 = vpop.xlane.xlu0 %418  ;;  %v483_v6 = vmul.f32 %v1191_v44, %v1191_v44 }
 0x1b6   :  { %v421_v61 = vpop.xlane.xlu1 %420  ;;  %v611_v25 = vadd.f32 %v1139_v36, %v589_v15  ;;  %v575_v19 = vmul.f32 %v919_v46, %v527_v14  ;;  %v460_v7 = vmul.f32 0.03125, %v419_v39  ;;  %v1207_v13 = vmul.f32 0.03125, %v1143_v20 }
 0x1b7   :  { %v461_v26 = vmul.f32 0.03125, %v421_v61  ;;  %821 = vst [vmem:[%s1265_s5 + $0x28] sm:$0xff] %v805_v21   ;;  %v626_v29 = vmax.f32 %v610_v22, 0.0  ;;  %v596_v33 = vmul.f32 %v1129_v18, %v574_v23 }
 0x1b8   :  { %v627_v35 = vmax.f32 %v611_v25, 0.0  ;;  %v597_v37 = vmul.f32 %v1129_v18, %v575_v19  ;;  %v492_v38 = vsub.f32 %v460_v7, %v476_v17  ;;  %v485_v19 = vmul.f32 %v1207_v13, %v1207_v13 }
 0x1b9   :  { %v493_v8 = vsub.f32 %v461_v26, %v477_v31  ;;  %v618_v28 = vadd.f32 %v1139_v36, %v596_v33  ;;  %v415_v45 = vpop.xlane.xlu0 %414  ;;  %v484_v31 = vmul.f32 %v1200_v0, %v1200_v0 }
 0x1ba   :  { %v417_v47 = vpop.xlane.xlu1 %416  ;;  %v780_v48 = vpack.c.bf16 %v627_v35, %v626_v29  ;;  %v619_v57 = vadd.f32 %v1139_v36, %v597_v37  ;;  %v508_v58 = vmax.f32 %v492_v38, 0.0  ;;  %v458_v16 = vmul.f32 0.03125, %v415_v45 }
 0x1bb   :  { %v509_v59 = vmax.f32 %v493_v8, 0.0  ;;  %v634_v60 = vmax.f32 %v618_v28, 0.0  ;;  %v459_v62 = vmul.f32 0.03125, %v417_v47  ;;  %v524_v37 = vsub.f32 %v1057_v49, %v1157_v1 }
 0x1bc   :  { %781 = vst [vmem:[%s1265_s5] sm:$0xff] %v780_v48   ;;  %v635_v63 = vmax.f32 %v619_v57, 0.0  ;;  %v540_v3 = vadd.f32 1e-05, %v508_v58  ;;  %v490_v27 = vsub.f32 %v458_v16, %v474_v12  ;;  %v525_v28 = vsub.f32 %v1059_v50, %v1159_v2 }
 0x1bd   :  { %v541_v4 = vadd.f32 1e-05, %v509_v59  ;;  %v491_v30 = vsub.f32 %v459_v62, %v475_v32  ;;  %v431_v9 = vpop.xlane.xlu0 %430  ;;  %v522_v59 = vsub.f32 %v1069_v53, %v1176_v24  ;;  %v530_v62 = vsub.f32 %v1075_v55, %v1189_v42 }
 0x1be   :  { %v433_v11 = vpop.xlane.xlu1 %432  ;;  %v800_v10 = vpack.c.bf16 %v635_v63, %v634_v60  ;;  %920 = vrsqrt.f32 %v540_v3  ;;  %v466_v43 = vmul.f32 0.03125, %v431_v9  ;;  %v506_v41 = vmax.f32 %v490_v27, 0.0 }
 0x1bf   :  { %v467_v40 = vmul.f32 0.03125, %v433_v11  ;;  %922 = vrsqrt.f32 %v541_v4  ;;  %v507_v14 = vmax.f32 %v491_v30, 0.0  ;;  %v523_v60 = vsub.f32 %v1071_v54, %v1183_v34 }
 0x1c0   :  { %820 = vst [vmem:[%s1265_s5 + $0x20] sm:$0xff] %v800_v10   ;;  %v498_v15 = vsub.f32 %v466_v43, %v482_v5  ;;  %v538_v46 = vadd.f32 1e-05, %v506_v41  ;;  %v531_v53 = vsub.f32 %v1077_v56, %v1191_v44  ;;  %v532_v55 = vsub.f32 %v1063_v51, %v1200_v0 }
 0x1c1   :  { %v499_v17 = vsub.f32 %v467_v40, %v483_v6  ;;  %v539_v21 = vadd.f32 1e-05, %v507_v14  ;;  %v435_v22 = vpop.xlane.xlu0 %434  ;;  %v533_v56 = vsub.f32 %v1065_v52, %v1207_v13 }
 0x1c2   :  { %v437_v23 = vpop.xlane.xlu1 %436  ;;  %v514_v39 = vmax.f32 %v498_v15, 0.0  ;;  %v468_v20 = vmul.f32 0.03125, %v435_v22  ;;  %924 = vrsqrt.f32 %v538_v46 }
 0x1c3   :  { %v515_v61 = vmax.f32 %v499_v17, 0.0  ;;  %v469_v25 = vmul.f32 0.03125, %v437_v23  ;;  %926 = vrsqrt.f32 %v539_v21 }
 0x1c4   :  { %v546_v7 = vadd.f32 1e-05, %v514_v39  ;;  %v500_v29 = vsub.f32 %v468_v20, %v484_v31 }
 0x1c5   :  { %v547_v26 = vadd.f32 1e-05, %v515_v61  ;;  %v501_v33 = vsub.f32 %v469_v25, %v485_v19 }
 0x1c6   :  { %928 = vrsqrt.f32 %v546_v7  ;;  %v516_v35 = vmax.f32 %v500_v29, 0.0 }
 0x1c7   :  { %930 = vrsqrt.f32 %v547_v26  ;;  %v517_v38 = vmax.f32 %v501_v33, 0.0 }
 0x1c8   :  { %v921_v8 = vpop.eup %920  ;;  %v548_v12 = vadd.f32 1e-05, %v516_v35 }
 0x1c9   :  { %v923_v45 = vpop.eup %922  ;;  %v572_v47 = vmul.f32 %v921_v8, %v524_v37  ;;  %v549_v48 = vadd.f32 1e-05, %v517_v38 }
 0x1ca   :  { %v573_v57 = vmul.f32 %v923_v45, %v525_v28  ;;  %932 = vrsqrt.f32 %v548_v12 }
 0x1cb   :  { %v594_v58 = vmul.f32 %v1129_v18, %v572_v47  ;;  %934 = vrsqrt.f32 %v549_v48 }
 0x1cc   :  { %v595_v49 = vmul.f32 %v1129_v18, %v573_v57  ;;  %v925_v1 = vpop.eup %924 }
 0x1cd   :  { %v616_v50 = vadd.f32 %v1139_v36, %v594_v58  ;;  %v927_v2 = vpop.eup %926  ;;  %v570_v16 = vmul.f32 %v925_v1, %v522_v59 }
 0x1ce   :  { %v617_v32 = vadd.f32 %v1139_v36, %v595_v49  ;;  %v571_v3 = vmul.f32 %v927_v2, %v523_v60 }
 0x1cf   :  { %v632_v63 = vmax.f32 %v616_v50, 0.0  ;;  %v592_v5 = vmul.f32 %v1129_v18, %v570_v16 }
 0x1d0   :  { %v929_v4 = vpop.eup %928  ;;  %v633_v24 = vmax.f32 %v617_v32, 0.0  ;;  %v593_v54 = vmul.f32 %v1129_v18, %v571_v3 }
 0x1d1   :  { %v931_v6 = vpop.eup %930  ;;  %v578_v34 = vmul.f32 %v929_v4, %v530_v62  ;;  %v614_v30 = vadd.f32 %v1139_v36, %v592_v5 }
 0x1d2   :  { %v795_v27 = vpack.c.bf16 %v633_v24, %v632_v63  ;;  %v579_v9 = vmul.f32 %v931_v6, %v531_v53  ;;  %v615_v42 = vadd.f32 %v1139_v36, %v593_v54 }
 0x1d3   :  { %v600_v11 = vmul.f32 %v1129_v18, %v578_v34  ;;  %v630_v44 = vmax.f32 %v614_v30, 0.0 }
 0x1d4   :  { %v933_v10 = vpop.eup %932  ;;  %819 = vst [vmem:[%s1265_s5 + $0x18] sm:$0xff] %v795_v27   ;;  %v601_v43 = vmul.f32 %v1129_v18, %v579_v9  ;;  %v631_v41 = vmax.f32 %v615_v42, 0.0 }
 0x1d5   :  { %v935_v40 = vpop.eup %934  ;;  %v622_v14 = vadd.f32 %v1139_v36, %v600_v11  ;;  %v580_v51 = vmul.f32 %v933_v10, %v532_v55 }
 0x1d6   :  { %v623_v0 = vadd.f32 %v1139_v36, %v601_v43  ;;  %v581_v15 = vmul.f32 %v935_v40, %v533_v56  ;;  %v790_v17 = vpack.c.bf16 %v631_v41, %v630_v44 }
 0x1d7   :  { %v638_v31 = vmax.f32 %v622_v14, 0.0  ;;  %v602_v46 = vmul.f32 %v1129_v18, %v580_v51 }
 0x1d8   :  { %v639_v52 = vmax.f32 %v623_v0, 0.0  ;;  %v603_v13 = vmul.f32 %v1129_v18, %v581_v15  ;;  %818 = vst [vmem:[%s1265_s5 + $0x10] sm:$0xff] %v790_v17  }
 0x1d9   :  { %v624_v21 = vadd.f32 %v1139_v36, %v602_v46 }
 0x1da   :  { %v810_v22 = vpack.c.bf16 %v639_v52, %v638_v31  ;;  %v625_v23 = vadd.f32 %v1139_v36, %v603_v13 }
 0x1db   :  { %v640_v39 = vmax.f32 %v624_v21, 0.0 }
 0x1dc   :  { %822 = vst [vmem:[%s1265_s5 + $0x30] sm:$0xff] %v810_v22   ;;  %v641_v61 = vmax.f32 %v625_v23, 0.0 }
 0x1de   :  { %v815_v20 = vpack.c.bf16 %v641_v61, %v640_v39 }
 0x1e0   :  { %823 = vst [vmem:[%s1265_s5 + $0x38] sm:$0xff] %v815_v20  }

</bundles_post_ra>
